<compile_context>
chip_gen: v6e
topology: v6e:2x2x1
jax: 0.10.0
libtpu: 0.0.40
codegen_flags: <defaults>
</compile_context>

<pallas_src>
import functools
import math

import jax
import jax.numpy as jnp
import numpy as np
from jax.experimental import pallas as pl
from jax.experimental.pallas import tpu as pltpu


# ----------------------------------------------------------------------------
# Fixed bilinear upsampling (fill_up_weights) as separable 1-D factor matrices.
# ----------------------------------------------------------------------------
def _bilinear_1d(kernel_size=16):
    f = math.ceil(kernel_size / 2)
    c = (2 * f - 1 - f % 2) / (2.0 * f)
    return np.array([1.0 - abs(i / f - c) for i in range(kernel_size)], dtype=np.float32)


def _upsample_matrix(n, kernel_size=16, stride=8, pad=4):
    """(No, n) matrix equivalent to the fixed depthwise ConvTranspose2d along one dim."""
    w1d = _bilinear_1d(kernel_size)
    no = (n - 1) * stride - 2 * pad + kernel_size
    U = np.zeros((no, n), dtype=np.float32)
    for o in range(no):
        for i in range(n):
            k = o + pad - stride * i
            if 0 <= k < kernel_size:
                U[o, i] = w1d[k]
    return U


@functools.lru_cache(maxsize=None)
def _upsample_factors(h, w):
    # Host-side numpy, cached across calls: no XLA kron, no large constant DMA.
    return _upsample_matrix(h), _upsample_matrix(w)


# ----------------------------------------------------------------------------
# Pallas kernel.  Grid = (batch n, Ho tile t).
#   t == 0 : stacked 1x1 convs + channel softmax (+steep) at low res -> scratch
#   every t: separable upsample of TH output rows, gating, log-softmax, store.
# ----------------------------------------------------------------------------
def _head_kernel(x_ref, w_ref, b_ref, uh_ref, uwt_ref, steep_ref,
                 out_ref, z_ref, *, classes, fields, h, w):
    c2 = classes + 3 * fields
    th = uh_ref.shape[0]
    wo = uwt_ref.shape[1]

    # ---- low-res stage: run once per image (tile axis is "arbitrary") ----
    @pl.when(pl.program_id(1) == 0)
    def _():
        x = x_ref[0]                                                     # (Cin, H*W)
        # One stacked MXU matmul for all four 1x1 convs.
        y = jnp.dot(w_ref[...], x, preferred_element_type=jnp.float32) + b_ref[...]
        fa = y[classes + 2 * fields:]                                    # (fields, H*W)
        # nn.Softmax2d == softmax over channels, at low res.
        fa = jnp.exp(fa - jnp.max(fa, axis=0, keepdims=True))
        # NOTE: exact divide kept on purpose (only fields*H*W elements at low
        # res); pl.reciprocal(approx=True) would loosen the 2e-3 tolerance.
        fa = fa / jnp.sum(fa, axis=0, keepdims=True)
        # Fold steepness here: upsample is linear, so steep*(fa@U) == (steep*fa)@U.
        fa = fa * steep_ref[0, 0]
        z = jnp.concatenate([y[:classes + 2 * fields], fa], axis=0)      # (C2, H*W)
        z_ref[...] = z.reshape(c2, h, w).astype(z_ref.dtype)

    # ---- separable x8 bilinear upsample of the stacked channels, TH rows ----
    z = z_ref[...]                                                       # (C2, H, W)
    uwt = uwt_ref[...]                                                   # (W, Wo)
    # H pass: t1[c,p,w] = sum_h Uh[p,h] z[c,h,w]  (small batched matmul over C2)
    uh_b = jnp.broadcast_to(uh_ref[...], (c2, th, h))                    # (C2, TH, H)
    t1 = jax.lax.dot_general(uh_b, z, (((2,), (1,)), ((0,), (0,))),
                             preferred_element_type=jnp.float32)         # (C2, TH, W)
    # W pass: one big lane-dense 2-D matmul (M = C2*TH, N = Wo).
    up = jnp.dot(t1.astype(uwt.dtype).reshape(c2 * th, w), uwt,
                 preferred_element_type=jnp.float32).reshape(c2, th, wo)  # (C2, TH, Wo)

    seg = up[:classes]                                                   # (classes, TH, Wo)
    xf = up[classes:classes + fields]
    yf = up[classes + fields:classes + 2 * fields]
    fa = up[classes + 2 * fields:]                                       # already *steep

    # LogSoftmax(dim=1) over the upsampled seg logits (channel axis == axis 0).
    m = jnp.max(seg, axis=0, keepdims=True)
    ls = seg - (m + jnp.log(jnp.sum(jnp.exp(seg - m), axis=0, keepdims=True)))

    # torch.cat((logsoftmax, y_field, x_field), dim=1): write each sub-range
    # straight into the output block (no (cout, TH, Wo) concat copy).
    out_ref[0, :classes] = ls.astype(out_ref.dtype)
    out_ref[0, classes] = jnp.sum(fa * yf, axis=0).astype(out_ref.dtype)      # y_field
    out_ref[0, classes + 1] = jnp.sum(fa * xf, axis=0).astype(out_ref.dtype)  # x_field


# ----------------------------------------------------------------------------
# Tile-size pick: keep per-tile high-res tensors well under v7x's 64 MiB VMEM.
# ----------------------------------------------------------------------------
def _pick_th(ho, wo, c_total, cout):
    bytes_per_row = (2 * c_total + 2 * cout) * wo * 4     # up tile + temps + dbl-buffered out
    budget = 24 << 20                                      # conservative across v5e/v6e/v7x
    th = min(ho, max(8, budget // max(bytes_per_row, 1)))
    th = min(th, max(8, ho // 2))                          # >=2 tiles/image -> pipelining
    th = max(8, (th // 8) * 8)
    while th > 8 and ho % th:
        th -= 8
    if ho % th:
        th = ho
    return th


# ----------------------------------------------------------------------------
# Wrapper
# ----------------------------------------------------------------------------
def drn_multifield_after_up(x_feat, params, *, classes, fields, th_tile=None,
                            mxu_dtype=jnp.float32):
    """x_feat: (N, Cin, H, W) float32 — output of self.base.
    Returns (N, classes+2, 8H, 8W)."""
    N, Cin, H, W = x_feat.shape
    HW = H * W
    Uh_np, Uw_np = _upsample_factors(H, W)
    Ho, Wo = Uh_np.shape[0], Uw_np.shape[0]
    cout = classes + 2
    c_total = classes + 3 * fields

    wseg, bseg, wxf, bxf, wyf, byf, wfa, bfa, steep = params
    # Stack the four 1x1-conv weights -> one matmul operand.
    w_all = jnp.concatenate([wseg, wxf, wyf, wfa], axis=0).astype(mxu_dtype)
    b_all = jnp.concatenate([bseg, bxf, byf, bfa], axis=0).reshape(c_total, 1).astype(jnp.float32)
    uh = jnp.asarray(Uh_np, dtype=mxu_dtype)          # (Ho, H)
    uwT = jnp.asarray(Uw_np.T, dtype=mxu_dtype)       # (W, Wo)
    x_flat = x_feat.reshape(N, Cin, HW).astype(mxu_dtype)
    steep2 = steep.reshape(1, 1).astype(jnp.float32)

    if th_tile is None:
        th_tile = _pick_th(Ho, Wo, c_total, cout)
    assert Ho % th_tile == 0 and th_tile % 8 == 0, (Ho, th_tile)

    kernel = functools.partial(_head_kernel, classes=classes, fields=fields, h=H, w=W)
    out = pl.pallas_call(
        kernel,
        out_shape=jax.ShapeDtypeStruct((N, cout, Ho, Wo), jnp.float32),
        grid_spec=pltpu.PrefetchScalarGridSpec(
            num_scalar_prefetch=0,
            grid=(N, Ho // th_tile),
            in_specs=[
                pl.BlockSpec((1, Cin, HW), lambda n, t: (n, 0, 0)),      # features (same block ∀ t)
                pl.BlockSpec((c_total, Cin), lambda n, t: (0, 0)),       # stacked 1x1 weights
                pl.BlockSpec((c_total, 1), lambda n, t: (0, 0)),         # stacked biases
                pl.BlockSpec((th_tile, H), lambda n, t: (t, 0)),         # Uh row tile
                pl.BlockSpec((W, Wo), lambda n, t: (0, 0)),              # Uw^T
                pl.BlockSpec((1, 1), lambda n, t: (0, 0)),               # steepness
            ],
            out_specs=pl.BlockSpec((1, cout, th_tile, Wo), lambda n, t: (n, 0, t, 0)),
            scratch_shapes=[pltpu.VMEM((c_total, H, W), mxu_dtype)],      # low-res stacked maps
        ),
        compiler_params=pltpu.CompilerParams(
            dimension_semantics=("parallel", "arbitrary"),
            vmem_limit_bytes=48 * 1024 * 1024,
        ),
    )(x_flat, w_all, b_all, uh, uwT, steep2)
    return out


# ----------------------------------------------------------------------------
# Pure-JAX reference (mirrors the PyTorch forward) for validation.
# ----------------------------------------------------------------------------
def reference(x_feat, params, *, classes, fields):
    N, Cin, H, W = x_feat.shape
    Uh_np, Uw_np = _upsample_factors(H, W)
    Uh, Uw = jnp.asarray(Uh_np), jnp.asarray(Uw_np)
    wseg, bseg, wxf, bxf, wyf, byf, wfa, bfa, steep = params

    def conv1x1(w, b):
        return jnp.einsum('oc,nchw->nohw', w, x_feat) + b[None, :, None, None]

    def up(z):  # fixed depthwise ConvTranspose2d(16, stride=8, pad=4) bilinear upsample
        return jnp.einsum('ph,nchw,qw->ncpq', Uh, z, Uw)

    seg = conv1x1(wseg, bseg)
    xf = up(conv1x1(wxf, bxf))
    yf = up(conv1x1(wyf, byf))
    fa = jax.nn.softmax(conv1x1(wfa, bfa), axis=1)
    fa = up(fa) * steep[0]
    x_field = jnp.sum(fa * xf, axis=1, keepdims=True)
    y_field = jnp.sum(fa * yf, axis=1, keepdims=True)
    ls = jax.nn.log_softmax(up(seg), axis=1)
    return jnp.concatenate([ls, y_field, x_field], axis=1)


if __name__ == "__main__":
    # Small synthetic shapes: base feature map with out_dim=32, 8x8 spatial.
    # NOTE: fields == classes is required by the PyTorch forward (shared `self.up`
    # depthwise upsampler is applied to the fields-channel activation map).
    N, Cin, H, W = 2, 32, 8, 8
    classes, fields = 4, 4

    key = jax.random.PRNGKey(0)
    ks = jax.random.split(key, 10)
    x_feat = jax.random.normal(ks[0], (N, Cin, H, W), jnp.float32)

    # seg: normal(0, sqrt(2/n)) with n = 1*1*classes, bias zero (as in __init__).
    wseg = jax.random.normal(ks[1], (classes, Cin), jnp.float32) * math.sqrt(2.0 / classes)
    bseg = jnp.zeros((classes,), jnp.float32)

    bound = 1.0 / math.sqrt(Cin)

    def kaiming_w(k, co):
        return jax.random.uniform(k, (co, Cin), jnp.float32, -bound, bound)

    def kaiming_b(k, co):
        return jax.random.uniform(k, (co,), jnp.float32, -bound, bound)

    wxf, bxf = kaiming_w(ks[2], fields), kaiming_b(ks[3], fields)
    wyf, byf = kaiming_w(ks[4], fields), kaiming_b(ks[5], fields)
    wfa, bfa = kaiming_w(ks[6], fields), kaiming_b(ks[7], fields)
    steep = jnp.ones((1,), jnp.float32)   # nn.Parameter(torch.ones(1))

    params = (wseg, bseg, wxf, bxf, wyf, byf, wfa, bfa, steep)

    out = drn_multifield_after_up(x_feat, params, classes=classes, fields=fields)
    out = jax.block_until_ready(out)
    assert out.shape == (N, classes + 2, 8 * H, 8 * W), out.shape

    ref = reference(x_feat, params, classes=classes, fields=fields)
    err = float(jnp.max(jnp.abs(out - ref)))
    assert err < 2e-3, f"kernel/reference mismatch: max abs err = {err}"

    print("KERNEL_OK")
</pallas_src>

<mosaic_0001>
module attributes {stable_mosaic.version = 11 : i64} {
  func.func @_head_kernel(%arg0: i32, %arg1: i32, %arg2: memref<1x32x64xf32, #tpu.memory_space<vmem>>, %arg3: memref<16x32xf32, #tpu.memory_space<vmem>>, %arg4: memref<16x1xf32, #tpu.memory_space<vmem>>, %arg5: memref<32x8xf32, #tpu.memory_space<vmem>>, %arg6: memref<8x64xf32, #tpu.memory_space<vmem>>, %arg7: memref<1x1xf32, #tpu.memory_space<vmem>>, %arg8: memref<1x6x32x64xf32, #tpu.memory_space<vmem>>, %arg9: memref<16x8x8xf32, #tpu.memory_space<vmem>>) attributes {dimension_semantics = [#tpu.dimension_semantics<parallel>, #tpu.dimension_semantics<arbitrary>], iteration_bounds = array<i64: 2, 2>, scalar_prefetch = 0 : i64, scratch_operands = 1 : i64, tpu.core_type = #tpu.core_type<tc>, window_params = [{transform_indices = @transform_0, window_bounds = array<i64: 1, 32, 64>}, {pipeline_mode = #tpu.pipeline_mode<synchronous>, transform_indices = @transform_1, window_bounds = array<i64: 16, 32>}, {pipeline_mode = #tpu.pipeline_mode<synchronous>, transform_indices = @transform_2, window_bounds = array<i64: 16, 1>}, {transform_indices = @transform_3, window_bounds = array<i64: 32, 8>}, {pipeline_mode = #tpu.pipeline_mode<synchronous>, transform_indices = @transform_4, window_bounds = array<i64: 8, 64>}, {pipeline_mode = #tpu.pipeline_mode<synchronous>, transform_indices = @transform_5, window_bounds = array<i64: 1, 1>}, {transform_indices = @transform_6, window_bounds = array<i64: 1, 6, 32, 64>}]} {
    %c0_i32 = arith.constant 0 : i32
    %0 = arith.cmpi eq, %arg1, %c0_i32 : i32
    %1 = arith.extui %0 : i1 to i32
    %c0_i32_0 = arith.constant 0 : i32
    %2 = arith.cmpi ne, %1, %c0_i32_0 : i32
    scf.if %2 {
      %c0_22 = arith.constant 0 : index
      %c0_23 = arith.constant 0 : index
      %c0_24 = arith.constant 0 : index
      %40 = vector.load %arg2[%c0_22, %c0_23, %c0_24] : memref<1x32x64xf32, #tpu.memory_space<vmem>>, vector<1x32x64xf32>
      %41 = vector.shape_cast %40 : vector<1x32x64xf32> to vector<32x64xf32>
      %c0_25 = arith.constant 0 : index
      %c0_26 = arith.constant 0 : index
      %42 = vector.load %arg3[%c0_25, %c0_26] : memref<16x32xf32, #tpu.memory_space<vmem>>, vector<16x32xf32>
      %cst_27 = arith.constant dense<0.000000e+00> : vector<16x64xf32>
      %43 = tpu.matmul %42, %41, %cst_27 {dimension_numbers = #tpu.dot_dimension_numbers<[1], [0], [0], [1], [0, 0, 1, 1], [], []>} : vector<16x32xf32>, vector<32x64xf32>, vector<16x64xf32> -> vector<16x64xf32>
      %c0_28 = arith.constant 0 : index
      %c0_29 = arith.constant 0 : index
      %44 = vector.load %arg4[%c0_28, %c0_29] : memref<16x1xf32, #tpu.memory_space<vmem>>, vector<16x1xf32>
      %45 = vector.broadcast %44 : vector<16x1xf32> to vector<16x64xf32>
      %46 = arith.addf %43, %45 : vector<16x64xf32>
      %47 = vector.extract_strided_slice %46 {offsets = [12, 0], sizes = [4, 64], strides = [1, 1]} : vector<16x64xf32> to vector<4x64xf32>
      %cst_30 = arith.constant dense<0xFF800000> : vector<64xf32>
      %48 = vector.multi_reduction <maximumf>, %47, %cst_30 [0] : vector<4x64xf32> to vector<64xf32>
      %49 = vector.shape_cast %48 : vector<64xf32> to vector<1x64xf32>
      %50 = vector.broadcast %49 : vector<1x64xf32> to vector<4x64xf32>
      %51 = arith.subf %47, %50 : vector<4x64xf32>
      %52 = math.exp %51 : vector<4x64xf32>
      %cst_31 = arith.constant dense<0.000000e+00> : vector<64xf32>
      %53 = vector.multi_reduction <add>, %52, %cst_31 [0] : vector<4x64xf32> to vector<64xf32>
      %54 = vector.shape_cast %53 : vector<64xf32> to vector<1x64xf32>
      %55 = vector.broadcast %54 : vector<1x64xf32> to vector<4x64xf32>
      %56 = arith.divf %52, %55 : vector<4x64xf32>
      %c0_32 = arith.constant 0 : index
      %c0_33 = arith.constant 0 : index
      %57 = vector.load %arg7[%c0_32, %c0_33] : memref<1x1xf32, #tpu.memory_space<vmem>>, vector<1x1xf32>
      %58 = vector.extract %57[0, 0] : f32 from vector<1x1xf32>
      %59 = vector.broadcast %58 : f32 to vector<4x64xf32>
      %60 = arith.mulf %56, %59 : vector<4x64xf32>
      %61 = vector.extract_strided_slice %46 {offsets = [0, 0], sizes = [12, 64], strides = [1, 1]} : vector<16x64xf32> to vector<12x64xf32>
      %62 = tpu.concatenate %61, %60 in 0 : vector<12x64xf32>, vector<4x64xf32> -> vector<16x64xf32>
      %63 = vector.shape_cast %62 : vector<16x64xf32> to vector<16x8x8xf32>
      %c0_34 = arith.constant 0 : index
      %c0_35 = arith.constant 0 : index
      %c0_36 = arith.constant 0 : index
      %64 = vector.load %arg9[%c0_34, %c0_35, %c0_36] : memref<16x8x8xf32, #tpu.memory_space<vmem>>, vector<16x8x8xf32>
      tpu.vector_store %arg9[%c0_34, %c0_35, %c0_36], %63 {strides = array<i32>} : memref<16x8x8xf32, #tpu.memory_space<vmem>>, vector<16x8x8xf32>,
    } else {
    }
    %c0 = arith.constant 0 : index
    %c0_1 = arith.constant 0 : index
    %c0_2 = arith.constant 0 : index
    %3 = vector.load %arg9[%c0, %c0_1, %c0_2] : memref<16x8x8xf32, #tpu.memory_space<vmem>>, vector<16x8x8xf32>
    %c0_3 = arith.constant 0 : index
    %c0_4 = arith.constant 0 : index
    %4 = vector.load %arg6[%c0_3, %c0_4] : memref<8x64xf32, #tpu.memory_space<vmem>>, vector<8x64xf32>
    %c0_5 = arith.constant 0 : index
    %c0_6 = arith.constant 0 : index
    %5 = vector.load %arg5[%c0_5, %c0_6] : memref<32x8xf32, #tpu.memory_space<vmem>>, vector<32x8xf32>
    %6 = vector.shape_cast %5 : vector<32x8xf32> to vector<1x32x8xf32>
    %7 = vector.broadcast %6 : vector<1x32x8xf32> to vector<16x32x8xf32>
    %cst = arith.constant dense<0.000000e+00> : vector<16x32x8xf32>
    %8 = tpu.matmul %7, %3, %cst {dimension_numbers = #tpu.dot_dimension_numbers<[2], [1], [1], [2], [0, 0, 0, 1, 1, 2], [0], [0]>} : vector<16x32x8xf32>, vector<16x8x8xf32>, vector<16x32x8xf32> -> vector<16x32x8xf32>
    %9 = vector.shape_cast %8 : vector<16x32x8xf32> to vector<512x8xf32>
    %cst_7 = arith.constant dense<0.000000e+00> : vector<512x64xf32>
    %10 = tpu.matmul %9, %4, %cst_7 {dimension_numbers = #tpu.dot_dimension_numbers<[1], [0], [0], [1], [0, 0, 1, 1], [], []>} : vector<512x8xf32>, vector<8x64xf32>, vector<512x64xf32> -> vector<512x64xf32>
    %11 = vector.shape_cast %10 : vector<512x64xf32> to vector<16x32x64xf32>
    %12 = vector.extract_strided_slice %11 {offsets = [0, 0, 0], sizes = [4, 32, 64], strides = [1, 1, 1]} : vector<16x32x64xf32> to vector<4x32x64xf32>
    %13 = vector.extract_strided_slice %11 {offsets = [4, 0, 0], sizes = [4, 32, 64], strides = [1, 1, 1]} : vector<16x32x64xf32> to vector<4x32x64xf32>
    %14 = vector.extract_strided_slice %11 {offsets = [8, 0, 0], sizes = [4, 32, 64], strides = [1, 1, 1]} : vector<16x32x64xf32> to vector<4x32x64xf32>
    %15 = vector.extract_strided_slice %11 {offsets = [12, 0, 0], sizes = [4, 32, 64], strides = [1, 1, 1]} : vector<16x32x64xf32> to vector<4x32x64xf32>
    %cst_8 = arith.constant dense<0xFF800000> : vector<32x64xf32>
    %16 = vector.multi_reduction <maximumf>, %12, %cst_8 [0] : vector<4x32x64xf32> to vector<32x64xf32>
    %17 = vector.shape_cast %16 : vector<32x64xf32> to vector<1x32x64xf32>
    %18 = vector.broadcast %17 : vector<1x32x64xf32> to vector<4x32x64xf32>
    %19 = arith.subf %12, %18 : vector<4x32x64xf32>
    %20 = math.exp %19 : vector<4x32x64xf32>
    %cst_9 = arith.constant dense<0.000000e+00> : vector<32x64xf32>
    %21 = vector.multi_reduction <add>, %20, %cst_9 [0] : vector<4x32x64xf32> to vector<32x64xf32>
    %22 = vector.shape_cast %21 : vector<32x64xf32> to vector<1x32x64xf32>
    %23 = math.log %22 : vector<1x32x64xf32>
    %24 = arith.addf %17, %23 : vector<1x32x64xf32>
    %25 = vector.broadcast %24 : vector<1x32x64xf32> to vector<4x32x64xf32>
    %26 = arith.subf %12, %25 : vector<4x32x64xf32>
    %c0_10 = arith.constant 0 : index
    %c0_11 = arith.constant 0 : index
    %c0_12 = arith.constant 0 : index
    %c0_13 = arith.constant 0 : index
    %27 = vector.load %arg8[%c0_10, %c0_11, %c0_12, %c0_13] : memref<1x6x32x64xf32, #tpu.memory_space<vmem>>, vector<1x4x32x64xf32>
    %28 = vector.shape_cast %27 : vector<1x4x32x64xf32> to vector<4x32x64xf32>
    %29 = vector.shape_cast %26 : vector<4x32x64xf32> to vector<1x4x32x64xf32>
    tpu.vector_store %arg8[%c0_10, %c0_11, %c0_12, %c0_13], %29 {strides = array<i32>} : memref<1x6x32x64xf32, #tpu.memory_space<vmem>>, vector<1x4x32x64xf32>,
    %30 = arith.mulf %15, %14 : vector<4x32x64xf32>
    %cst_14 = arith.constant dense<0.000000e+00> : vector<32x64xf32>
    %31 = vector.multi_reduction <add>, %30, %cst_14 [0] : vector<4x32x64xf32> to vector<32x64xf32>
    %c0_15 = arith.constant 0 : index
    %c4 = arith.constant 4 : index
    %c0_16 = arith.constant 0 : index
    %c0_17 = arith.constant 0 : index
    %32 = vector.load %arg8[%c0_15, %c4, %c0_16, %c0_17] : memref<1x6x32x64xf32, #tpu.memory_space<vmem>>, vector<1x1x32x64xf32>
    %33 = vector.shape_cast %32 : vector<1x1x32x64xf32> to vector<32x64xf32>
    %34 = vector.shape_cast %31 : vector<32x64xf32> to vector<1x1x32x64xf32>
    tpu.vector_store %arg8[%c0_15, %c4, %c0_16, %c0_17], %34 {strides = array<i32>} : memref<1x6x32x64xf32, #tpu.memory_space<vmem>>, vector<1x1x32x64xf32>,
    %35 = arith.mulf %15, %13 : vector<4x32x64xf32>
    %cst_18 = arith.constant dense<0.000000e+00> : vector<32x64xf32>
    %36 = vector.multi_reduction <add>, %35, %cst_18 [0] : vector<4x32x64xf32> to vector<32x64xf32>
    %c0_19 = arith.constant 0 : index
    %c5 = arith.constant 5 : index
    %c0_20 = arith.constant 0 : index
    %c0_21 = arith.constant 0 : index
    %37 = vector.load %arg8[%c0_19, %c5, %c0_20, %c0_21] : memref<1x6x32x64xf32, #tpu.memory_space<vmem>>, vector<1x1x32x64xf32>
    %38 = vector.shape_cast %37 : vector<1x1x32x64xf32> to vector<32x64xf32>
    %39 = vector.shape_cast %36 : vector<32x64xf32> to vector<1x1x32x64xf32>
    tpu.vector_store %arg8[%c0_19, %c5, %c0_20, %c0_21], %39 {strides = array<i32>} : memref<1x6x32x64xf32, #tpu.memory_space<vmem>>, vector<1x1x32x64xf32>,
    return
  }
  func.func @transform_0(%arg0: i32, %arg1: i32) -> (i32, i32, i32) {
    %c0_i32 = arith.constant 0 : i32
    %c0_i32_0 = arith.constant 0 : i32
    %c0_i32_1 = arith.constant 0 : i32
    return %arg0, %c0_i32, %c0_i32_0 : i32, i32, i32
  }
  func.func @transform_1(%arg0: i32, %arg1: i32) -> (i32, i32) {
    %c0_i32 = arith.constant 0 : i32
    %c0_i32_0 = arith.constant 0 : i32
    %c0_i32_1 = arith.constant 0 : i32
    return %c0_i32, %c0_i32_0 : i32, i32
  }
  func.func @transform_2(%arg0: i32, %arg1: i32) -> (i32, i32) {
    %c0_i32 = arith.constant 0 : i32
    %c0_i32_0 = arith.constant 0 : i32
    %c0_i32_1 = arith.constant 0 : i32
    return %c0_i32, %c0_i32_0 : i32, i32
  }
  func.func @transform_3(%arg0: i32, %arg1: i32) -> (i32, i32) {
    %c0_i32 = arith.constant 0 : i32
    %c0_i32_0 = arith.constant 0 : i32
    return %arg1, %c0_i32 : i32, i32
  }
  func.func @transform_4(%arg0: i32, %arg1: i32) -> (i32, i32) {
    %c0_i32 = arith.constant 0 : i32
    %c0_i32_0 = arith.constant 0 : i32
    %c0_i32_1 = arith.constant 0 : i32
    return %c0_i32, %c0_i32_0 : i32, i32
  }
  func.func @transform_5(%arg0: i32, %arg1: i32) -> (i32, i32) {
    %c0_i32 = arith.constant 0 : i32
    %c0_i32_0 = arith.constant 0 : i32
    %c0_i32_1 = arith.constant 0 : i32
    return %c0_i32, %c0_i32_0 : i32, i32
  }
  func.func @transform_6(%arg0: i32, %arg1: i32) -> (i32, i32, i32, i32) {
    %c0_i32 = arith.constant 0 : i32
    %c0_i32_0 = arith.constant 0 : i32
    %c0_i32_1 = arith.constant 0 : i32
    return %arg0, %c0_i32, %arg1, %c0_i32_0 : i32, i32, i32, i32
  }
}

</mosaic_0001>

<bundles_post_ra>
// kernel: tpu_custom_call.1
= control target key start
LH: loop header
LB: loop body
LE: loop exit
PB: predicated region body
PF: predicated region fallthrough
CT: control target
= control target key end

     0   :  { %s4664_s0 = inlined_call_operand.vmem [shape: f32[2,32,64], index: 0, kind: input, shape index: {}]   ;;  %s4665_s1 = inlined_call_operand.vmem [shape: f32[16,32], index: 1, kind: input, shape index: {}]   ;;  %s4666_s2 = inlined_call_operand.vmem [shape: f32[16,1], index: 2, kind: input, shape index: {}]   ;;  %s4667_s3 = inlined_call_operand.vmem [shape: f32[64,8], index: 3, kind: input, shape index: {}]   ;;  %s4668_s4 = inlined_call_operand.vmem [shape: f32[8,64], index: 4, kind: input, shape index: {}]   ;;  %s4669_s5 = inlined_call_operand.<no memory space> [shape: f32[1,1], index: 5, kind: input, shape index: {}]   ;;  %s4670_s6 = inlined_call_operand.hbm [shape: f32[2,6,64,64], index: 6, kind: output, shape index: {}]  }
   0x1   :  { %v11_v0 = vstv %s4669_s5 }
   0x2   :  { %12 = vst [vmem:[#allocation3] sm:$0x1] %v11_v0 }
   0x3   :  { %13 = vsyncpa [#allocation5], 0 }
   0x4   :  { %15 = vsyncpa [#allocation5 + $0x1], 0  ;;  %s3910_s23 = smov 0   ;;  %s3912_s24 = smov 0  }
   0x5   :  { %s3914_s25 = smov 0   ;;  %s3916_s26 = smov 0  }
   0x6   :  { %s3918_s27 = smov 0   ;;  %s3920_s28 = smov 0  }
   0x7   :  { %s3922_s29 = smov 0   ;;  %s3924_s30 = smov 0  }
   0x8 LB: > { %s3101_s5 = sadd.s32 4294967295, %s3853_s30   ;;  %s3102_s7 = sadd.s32 4294967294, %s3853_s30   ;;  %s3853_s30 = sphi %s3924_s30, %s21_s30   ;;  %s3849_s29 = sphi %s3922_s29, %s4687_s29   ;;  %s3845_s28 = sphi %s3920_s28, %s4686_s28   ;;  %s3841_s27 = sphi %s3918_s27, %s4685_s27   ;;  %s3837_s26 = sphi %s3916_s26, %s4684_s26   ;;  %s3833_s25 = sphi %s3914_s25, %s4683_s25   ;;  %s3829_s24 = sphi %s3912_s24, %s4682_s24   ;;  %s3825_s23 = sphi %s3910_s23, %s4681_s23  }
   0x9   : > { %s30_s8 = sadd.s32 1, %s3845_s28  ;;  %s33_s9 = sadd.s32 1, %s3849_s29 }
   0xa   : > { %p31_p0 = scmp.ge.s32.totalorder %s30_s8, 2  ;;  %p188_p1 = scmp.ne.s32.totalorder %s3833_s25, %s3829_s24 }
   0xb   : > { %p189_p2 = scmp.eq.s32.totalorder %s3101_s5, 3  ;;  %p194_p5 = scmp.ne.s32.totalorder %s3829_s24, %s3825_s23 }
   0xc   : > { %s4689_s8 = smov (%p31_p0, %s30_s8), 0  ;;  %s4691_s9 = smov (!%p31_p0, %s33_s9), %s3849_s29 }
   0xd   : > { %4674 = sst [smem:[#allocation9_spill]] %s4689_s8  ;;  %s174_s10 = ssub.s32 %s3845_s28, %s4689_s8 }
   0xe   : > { %p3961_p3 = por %p189_p2, %p188_p1  ;;  %p35_p4 = scmp.ge.s32.totalorder %s4691_s9, 2 }
   0xf   : > { %p195_p6 = scmp.eq.s32.totalorder %s3102_s7, 3  ;;  %p3105_p7 = scmp.ge.s32.totalorder %s3853_s30, 1 }
  0x10   : > { %s4693_s9 = smov (%p35_p4, %s4691_s9), 0  ;;  %p242_p9 = scmp.lt.s32.totalorder %s3853_s30, 5 }
  0x11   : > { %4676 = sst [smem:[#allocation10_spill]] %s4693_s9  ;;  %p3970_p8 = por %p195_p6, %p194_p5 }
  0x12   : > { %s173_s13 = ssub.s32 %s3849_s29, %s4693_s9  ;;  %s178_s14 = sadd.s32 1, %s3833_s25 }
  0x13   : > { %s175_s15 = sor.u32 %s174_s10, %s173_s13  ;;  %p243_p10 = pnand %p3105_p7, %p242_p9 }
  0x14   : > { %p176_p11 = scmp.eq.s32.totalorder %s175_s15, 0  ;;  %s4673_s17 = sand.u32 (!%p243_p10), 1, %s3829_s24  }
  0x15   : > { %246 = sbr.rel (%p243_p10) target bundleno = 958 (0x3be), region = 44  ;;  %p277_p12 = scmp.lt.s32.totalorder (!%p243_p10), %s3841_s27, 1 }
  0x16   : > { %s3979_s16 = scalar_select %p176_p11, %s3833_s25, %s178_s14  }
  0x17   : > { %s3644_s18 = smul.u32 (!%p243_p10), 192, %s4673_s17  ;;  %s3986_s19 = sshll.u32 (!%p243_p10), %s3837_s26, 2 }
  0x18   : > { %p283_p13 = scmp.lt.s32.totalorder (!%p243_p10), %s3986_s19, 7  ;;  %p3110_p0 = scmp.ne.s32.totalorder (!%p243_p10), %s3837_s26, 0 }
  0x19   : > { %s3999_s8 = scalar_lea.vmem (!%p243_p10), [#allocation4], %s3644_s18 }
  0x1a   : > { %s278_s20 = scalar_select %p277_p12, %s3841_s27, 1 }
  0x1b   : > { %s284_s10 = scalar_select %p283_p13, %s3986_s19, 7 }
  0x1c   : > { %s3253_s21 = sshll.u32 %s278_s20, 5  ;;  %292 = sbr.rel (%p3110_p0) target bundleno = 455 (0x1c7), region = 48 }
  0x1d   : > { %s281_s7 = scalar_lea.vmem %s4664_s0, %s3253_s21  ;;  %s3109_s13 = sshll.u32 %s284_s10, 3 }
  0x1e   : > { %s3997_s9 = scalar_lea.vmem %s4667_s3, %s3109_s13  ;;  %s3857_s10 = smov (!%p3110_p0), 120  }
  0x1f   : > { %s3858_s13 = smov (!%p3110_p0), 104   ;;  %s3859_s14 = smov (!%p3110_p0), 96  }
  0x20   : > { %s3860_s15 = smov (!%p3110_p0), 88   ;;  %s3861_s20 = smov (!%p3110_p0), 80  }
  0x21   : > { %v296_v1 = vld [vmem:[%s281_s7 + $0x18] sm:$0xff]  ;;  %v295_v2 = vld [vmem:[%s281_s7 + $0x10] sm:$0xff]  ;;  %vm311_vm0 = vcmask 261120   ;;  %v297_v3 = vld [vmem:[%s4665_s1] sm:$0xff]  ;;  %v3855_v4 = vmov 0   ;;  %vm393_vm1 = vcmask 523268   ;;  %v472_v44 = vlaneseq }
  0x22   : > { %3405 = vmatprep.subr.mxu0 %v296_v1  ;;  %3742 = vset.pattern.permute.xlu0 %v3855_v4  ;;  %v294_v5 = vld [vmem:[%s281_s7 + $0x8] sm:$0xff]  ;;  %v293_v7 = vld [vmem:[%s281_s7] sm:$0xff]  ;;  %s3856_s7 = smov 112   ;;  %s3862_s21 = smov 72   ;;  %vm407_vm2 = vcmask 519168   ;;  %vm421_vm3 = vcmask 1043456  }
  0x23   : > { %3406 = vmatpush3.msra.mxu0 %v296_v1  ;;  %3413 = vmatprep.mubr.msk.f32.mxu0 %vm311_vm0, %v297_v3  ;;  %v300_v6 = vld [vmem:[%s4666_s2 + $0x8] sm:$0xff]  ;;  %v299_v8 = vld [vmem:[%s4666_s2] sm:$0xff]  ;;  %v3863_v42 = vmov 1983009808   ;;  %v473_v47 = vshrl.u32 %v472_v44, 7  ;;  %vm739_vm4 = vcmask 64512  }
  0x24   : > { %3407 = vmatprep.subr.mxu0 %v295_v2  ;;  %308 = vperm.xlu0 %3742, %v300_v6   ;;  %v298_v9 = vld [vmem:[%s4665_s1 + $0x8] sm:$0xff]  ;;  %v417_v10 = vld [vmem:[#allocation3] sm:$0x1]  ;;  %v470_v43 = vunpack.c.l.s4 %v3863_v42  ;;  %v3864_v50 = vmov 1934713408  }
  0x25   : > { %3408 = vmatpush3.msra.mxu0 %v295_v2  ;;  %3645 = vpush %v417_v10  ;;  %v534_v51 = vunpack.c.l.s4 %v3864_v50 }
  0x26   : > { %3409 = vmatprep.subr.mxu0 %v294_v5  ;;  %v471_v46 = vunpack.c.0.s8 %v470_v43 }
  0x27   : > { %3410 = vmatpush3.msra.mxu0 %v294_v5  ;;  %v535_v58 = vunpack.c.0.s8 %v534_v51 }
  0x28   : > { %3411 = vmatprep.subr.mxu0 %v293_v7  ;;  %303 = vperm.xlu0 %3742, %v299_v8   ;;  %v4044_v53 = vsub.s32 %v471_v46, %v473_v47 }
  0x29   : > { %3412 = vmatpush3.msra.mxu0 %v293_v7  ;;  %v4052_v4 = vsub.s32 %v535_v58, %v473_v47 }
  0x2a   : > { %3414 = vmatmul.mubr.msk.f32.vlgmr.msra.gmra.mxu0 %vm311_vm0, %v298_v9 }
  0x56   : > { %s3646_s18 = spop %3645 }
  0x57   : > { %v419_v36 = vstv %s3646_s18 }
  0x9f   : > { %v309_v11 = vpop.permute.xlu0 %308 }
  0xa3   : > { %v304_v14 = vpop.permute.xlu0 %303 }
  0xea   : > { %v3415_v12 = vpop.f32.mrf.mxu0 }
  0xeb   : > { %v390_v13 = vadd.f32 %v3415_v12, %v309_v11 }
  0xec   : > { %v384_v15 = vpop.f32.mrf.mxu0 }
  0xed   : > { %v394_v16 = vsel %vm393_vm1, %v390_v13, -inf  ;;  %v4016_v17 = vadd.f32 %v384_v15, %v304_v14 }
  0xee   : > { %v395_v18 = vrot.slane %v394_v16, 4 }
  0xef   : > { %431 = vrot.lane.b32.xlu0 %v4016_v17, %s3856_s7  ;;  %425 = vrot.lane.b32.xlu1 %v4016_v17, %s3857_s10 }
  0xf0   : > { %v396_v19 = vmax.f32 %v394_v16, %v395_v18 }
  0xf2   : > { %v397_v20 = vrot.slane %v396_v19, 2 }
  0xf3   : > { %437 = vrot.lane.b32.xlu0 %v4016_v17, %s3858_s13 }
  0xf4   : > { %v398_v21 = vmax.f32 %v396_v19, %v397_v20 }
  0xf6   : > { %v399_v22 = vrot.slane %v398_v21, 1 }
  0xf7   : > { %443 = vrot.lane.b32.xlu0 %v4016_v17, %s3859_s14 }
  0xf8   : > { %v400_v23 = vmax.f32 %v398_v21, %v399_v22 }
  0xfa   : > { %v401_v24 = vsub.f32 %v390_v13, %v400_v23 }
  0xfb   : > { %449 = vrot.lane.b32.xlu0 %v4016_v17, %s3860_s15 }
  0xfc   : > { %v402_v25 = vmul.f32 1.442695, %v401_v24 }
  0xfe   : > { %3743 = vpow2.f32 %v402_v25 }
  0xff   : > { %455 = vrot.lane.b32.xlu0 %v4016_v17, %s3861_s20 }
 0x103   : > { %461 = vrot.lane.b32.xlu0 %v4016_v17, %s3862_s21 }
 0x10b   : > { %v3744_v26 = vpop.eup %3743 }
 0x10c   : > { %v405_v27 = vrot.slane %v3744_v26, 4 }
 0x10e   : > { %v408_v28 = vsel %vm407_vm2, %v405_v27, 0.0 }
 0x10f   : > { %v409_v29 = vrot.slane %v408_v28, 4 }
 0x111   : > { %v410_v30 = vadd.f32 %v409_v29, %v408_v28 }
 0x113   : > { %v411_v31 = vrot.slane %v410_v30, 2 }
 0x115   : > { %v412_v32 = vadd.f32 %v411_v31, %v410_v30 }
 0x117   : > { %v413_v33 = vrot.slane %v412_v32, 1 }
 0x119   : > { %v414_v34 = vadd.f32 %v413_v33, %v412_v32 }
 0x11b   : > { %3745 = vrcp.f32 %v414_v34 }
 0x128   : > { %v3746_v35 = vpop.eup %3745 }
 0x129   : > { %v416_v37 = vmul.f32 %v3746_v35, %v3744_v26 }
 0x12b   : > { %v420_v38 = vmul.f32 %v419_v36, %v416_v37 }
 0x12d   : > { %v4030_v39 = vsel %vm421_vm3, %v390_v13, %v420_v38 }
 0x12e   : > { %427 = vrot.lane.b32.xlu1 %v4030_v39, %s3857_s10 }
 0x132   : > { %433 = vrot.lane.b32.xlu1 %v4030_v39, %s3856_s7 }
 0x136   : > { %439 = vrot.lane.b32.xlu1 %v4030_v39, %s3858_s13 }
 0x13a   : > { %445 = vrot.lane.b32.xlu1 %v4030_v39, %s3859_s14 }
 0x13e   : > { %451 = vrot.lane.b32.xlu1 %v4030_v39, %s3860_s15 }
 0x142   : > { %457 = vrot.lane.b32.xlu1 %v4030_v39, %s3861_s20 }
 0x146   : > { %463 = vrot.lane.b32.xlu1 %v4030_v39, %s3862_s21 }
 0x161   : > { %v432_v40 = vpop.permute.xlu0 %431  ;;  %v426_v49 = vpop.permute.xlu1 %425 }
 0x162   : > { %v467_v54 = vcombine.low %v4016_v17, %v432_v40  ;;  %v468_v57 = vcombine.high %v4016_v17, %v432_v40 }
 0x164   : > { %v475_v62 = vrot.slane %v467_v54, %v4044_v53  ;;  %v482_v3 = vrot.slane %v468_v57, %v4044_v53 }
 0x165   : > { %v438_v41 = vpop.permute.xlu0 %437 }
 0x166   : > { %v483_v52 = vcombine.low %v426_v49, %v438_v41  ;;  %v484_v55 = vcombine.high %v426_v49, %v438_v41 }
 0x168   : > { %v491_v59 = vrot.slane %v483_v52, %v4044_v53  ;;  %v498_v63 = vrot.slane %v484_v55, %v4044_v53 }
 0x169   : > { %v444_v45 = vpop.permute.xlu0 %443 }
 0x16a   : > { %v531_v5 = vcombine.low %v475_v62, %v491_v59  ;;  %v532_v6 = vcombine.high %v475_v62, %v491_v59  ;;  %v547_v11 = vcombine.low %v482_v3, %v498_v63  ;;  %v548_v12 = vcombine.high %v482_v3, %v498_v63 }
 0x16c   : > { %v539_v17 = vrot.slane %v531_v5, %v4052_v4  ;;  %v546_v18 = vrot.slane %v532_v6, %v4052_v4  ;;  %v555_v23 = vrot.slane %v547_v11, %v4052_v4  ;;  %v562_v24 = vrot.slane %v548_v12, %v4052_v4 }
 0x16d   : > { %v450_v48 = vpop.permute.xlu0 %449 }
 0x171   : > { %v456_v56 = vpop.permute.xlu0 %455 }
 0x172   : > { %v499_v60 = vcombine.low %v444_v45, %v456_v56  ;;  %v500_v61 = vcombine.high %v444_v45, %v456_v56 }
 0x174   : > { %v507_v7 = vrot.slane %v499_v60, %v4044_v53  ;;  %v514_v8 = vrot.slane %v500_v61, %v4044_v53 }
 0x175   : > { %v462_v0 = vpop.permute.xlu0 %461 }
 0x176   : > { %v515_v1 = vcombine.low %v450_v48, %v462_v0  ;;  %v516_v2 = vcombine.high %v450_v48, %v462_v0 }
 0x178   : > { %v523_v9 = vrot.slane %v515_v1, %v4044_v53  ;;  %v530_v10 = vrot.slane %v516_v2, %v4044_v53 }
 0x17a   : > { %v563_v13 = vcombine.low %v507_v7, %v523_v9  ;;  %v564_v14 = vcombine.high %v507_v7, %v523_v9  ;;  %v579_v15 = vcombine.low %v514_v8, %v530_v10  ;;  %v580_v16 = vcombine.high %v514_v8, %v530_v10 }
 0x17c   : > { %v571_v19 = vrot.slane %v563_v13, %v4052_v4  ;;  %v578_v20 = vrot.slane %v564_v14, %v4052_v4  ;;  %v587_v21 = vrot.slane %v579_v15, %v4052_v4  ;;  %v594_v22 = vrot.slane %v580_v16, %v4052_v4 }
 0x17e   : > { %v595_v25 = vcombine.low %v539_v17, %v571_v19  ;;  %v596_v26 = vcombine.high %v539_v17, %v571_v19  ;;  %v597_v27 = vcombine.low %v546_v18, %v578_v20  ;;  %v598_v28 = vcombine.high %v546_v18, %v578_v20 }
 0x17f   : > { %v599_v29 = vcombine.low %v555_v23, %v587_v21  ;;  %v600_v30 = vcombine.high %v555_v23, %v587_v21  ;;  %v601_v31 = vcombine.low %v562_v24, %v594_v22  ;;  %v602_v32 = vcombine.high %v562_v24, %v594_v22 }
 0x180   : > { %740 = vst.msk [vmem:[#allocation2] sm:$0xff] %vm739_vm4, %v595_v25  ;;  %741 = vst.msk [vmem:[#allocation2 + $0x8] sm:$0xff] %vm739_vm4, %v596_v26 }
 0x181   : > { %742 = vst.msk [vmem:[#allocation2 + $0x10] sm:$0xff] %vm739_vm4, %v597_v27  ;;  %743 = vst.msk [vmem:[#allocation2 + $0x18] sm:$0xff] %vm739_vm4, %v598_v28 }
 0x182   : > { %744 = vst.msk [vmem:[#allocation2 + $0x20] sm:$0xff] %vm739_vm4, %v599_v29  ;;  %745 = vst.msk [vmem:[#allocation2 + $0x28] sm:$0xff] %vm739_vm4, %v600_v30 }
 0x183   : > { %746 = vst.msk [vmem:[#allocation2 + $0x30] sm:$0xff] %vm739_vm4, %v601_v31  ;;  %747 = vst.msk [vmem:[#allocation2 + $0x38] sm:$0xff] %vm739_vm4, %v602_v32 }
 0x1a0   : > { %v428_v33 = vpop.permute.xlu1 %427 }
 0x1a4   : > { %v434_v34 = vpop.permute.xlu1 %433 }
 0x1a5   : > { %v603_v40 = vcombine.low %v4030_v39, %v434_v34  ;;  %v604_v43 = vcombine.high %v4030_v39, %v434_v34 }
 0x1a7   : > { %v611_v47 = vrot.slane %v603_v40, %v4044_v53  ;;  %v618_v52 = vrot.slane %v604_v43, %v4044_v53 }
 0x1a8   : > { %v440_v35 = vpop.permute.xlu1 %439 }
 0x1a9   : > { %v619_v38 = vcombine.low %v428_v33, %v440_v35  ;;  %v620_v41 = vcombine.high %v428_v33, %v440_v35 }
 0x1ab   : > { %v627_v44 = vrot.slane %v619_v38, %v4044_v53  ;;  %v634_v48 = vrot.slane %v620_v41, %v4044_v53 }
 0x1ac   : > { %v446_v36 = vpop.permute.xlu1 %445 }
 0x1ad   : > { %v667_v54 = vcombine.low %v611_v47, %v627_v44  ;;  %v668_v55 = vcombine.high %v611_v47, %v627_v44  ;;  %v683_v59 = vcombine.low %v618_v52, %v634_v48  ;;  %v684_v60 = vcombine.high %v618_v52, %v634_v48 }
 0x1af   : > { %v675_v1 = vrot.slane %v667_v54, %v4052_v4  ;;  %v682_v2 = vrot.slane %v668_v55, %v4052_v4  ;;  %v698_v8 = vrot.slane %v684_v60, %v4052_v4 }
 0x1b0   : > { %v452_v37 = vpop.permute.xlu1 %451 }
 0x1b4   : > { %v458_v42 = vpop.permute.xlu1 %457 }
 0x1b5   : > { %v635_v45 = vcombine.low %v446_v36, %v458_v42  ;;  %v636_v46 = vcombine.high %v446_v36, %v458_v42 }
 0x1b7   : > { %v643_v56 = vrot.slane %v635_v45, %v4044_v53  ;;  %v650_v57 = vrot.slane %v636_v46, %v4044_v53 }
 0x1b8   : > { %v464_v49 = vpop.permute.xlu1 %463 }
 0x1b9   : > { %v651_v50 = vcombine.low %v452_v37, %v464_v49  ;;  %v652_v51 = vcombine.high %v452_v37, %v464_v49 }
 0x1bb   : > { %v659_v39 = vrot.slane %v651_v50, %v4044_v53  ;;  %v666_v58 = vrot.slane %v652_v51, %v4044_v53  ;;  %v691_v53 = vrot.slane %v683_v59, %v4052_v4 }
 0x1bd   : > { %v699_v61 = vcombine.low %v643_v56, %v659_v39  ;;  %v700_v62 = vcombine.high %v643_v56, %v659_v39  ;;  %v715_v63 = vcombine.low %v650_v57, %v666_v58  ;;  %v716_v0 = vcombine.high %v650_v57, %v666_v58 }
 0x1bf   : > { %v707_v3 = vrot.slane %v699_v61, %v4052_v4  ;;  %v714_v5 = vrot.slane %v700_v62, %v4052_v4  ;;  %v723_v6 = vrot.slane %v715_v63, %v4052_v4  ;;  %v730_v7 = vrot.slane %v716_v0, %v4052_v4 }
 0x1c1   : > { %v731_v9 = vcombine.low %v675_v1, %v707_v3  ;;  %v732_v10 = vcombine.high %v675_v1, %v707_v3  ;;  %v733_v11 = vcombine.low %v682_v2, %v714_v5  ;;  %v734_v12 = vcombine.high %v682_v2, %v714_v5 }
 0x1c2   : > { %v735_v13 = vcombine.low %v691_v53, %v723_v6  ;;  %v736_v14 = vcombine.high %v691_v53, %v723_v6  ;;  %v737_v15 = vcombine.low %v698_v8, %v730_v7  ;;  %v738_v16 = vcombine.high %v698_v8, %v730_v7 }
 0x1c3   : > { %748 = vst.msk [vmem:[#allocation2 + $0x40] sm:$0xff] %vm739_vm4, %v731_v9  ;;  %749 = vst.msk [vmem:[#allocation2 + $0x48] sm:$0xff] %vm739_vm4, %v732_v10 }
 0x1c4   : > { %750 = vst.msk [vmem:[#allocation2 + $0x50] sm:$0xff] %vm739_vm4, %v733_v11  ;;  %751 = vst.msk [vmem:[#allocation2 + $0x58] sm:$0xff] %vm739_vm4, %v734_v12 }
 0x1c5   : > { %752 = vst.msk [vmem:[#allocation2 + $0x60] sm:$0xff] %vm739_vm4, %v735_v13  ;;  %753 = vst.msk [vmem:[#allocation2 + $0x68] sm:$0xff] %vm739_vm4, %v736_v14 }
 0x1c6   : > { %754 = vst.msk [vmem:[#allocation2 + $0x70] sm:$0xff] %vm739_vm4, %v737_v15  ;;  %755 = vst.msk [vmem:[#allocation2 + $0x78] sm:$0xff] %vm739_vm4, %v738_v16 }
 0x1c7 PF: > { %v756_v4 = vld [vmem:[#allocation2] sm:$0xff]  ;;  %vm777_vm5 = vcmask 64512   ;;  %v4104_v18 = vld [vmem:[%s3997_s9 + $0x8] sm:$0xff]  ;;  %v758_v19 = vld [vmem:[#allocation2 + $0x10] sm:$0xff]  ;;  %vm2727_vm6 = vcmask 523264   ;;  %s4678_s22 = sand.u32 1, %s3829_s24  }
 0x1c8   : > { %v4101_v17 = vld [vmem:[%s3997_s9] sm:$0xff]  ;;  %3416 = vmatprep.subr.mxu0 %v756_v4  ;;  %v4109_v20 = vld [vmem:[%s3997_s9 + $0x10] sm:$0xff]  ;;  %v757_v21 = vld [vmem:[#allocation2 + $0x8] sm:$0xff]  ;;  %s2975_s17 = scalar_lea.sflag [#allocation5], %s4678_s22 }
 0x1c9   : > { %3418 = vmatprep.mubr.msk.f32.mxu0 %vm777_vm5, %v4101_v17  ;;  %3417 = vmatpush3.msra.mxu0 %v756_v4  ;;  %v760_v22 = vld [vmem:[#allocation2 + $0x20] sm:$0xff]  ;;  %v4118_v23 = vld [vmem:[%s3997_s9 + $0x18] sm:$0xff]  ;;  %v761_v25 = vld [vmem:[#allocation2 + $0x28] sm:$0xff] }
 0x1ca   : > { %3426 = vmatprep.mubr.msk.f32.mxu1 %vm777_vm5, %v4101_v17  ;;  %3419 = vmatmul.mubr.msk.f32.vlgmr.msra.gmra.mxu0 %vm777_vm5, %v4104_v18  ;;  %v759_v24 = vld [vmem:[#allocation2 + $0x18] sm:$0xff]  ;;  %v762_v26 = vld [vmem:[#allocation2 + $0x30] sm:$0xff]  ;;  %v764_v28 = vld [vmem:[#allocation2 + $0x40] sm:$0xff] }
 0x1cb   : > { %3432 = vmatprep.subr.mxu0 %v758_v19  ;;  %3421 = vmatprep.mubr.msk.f32.mxu0 %vm777_vm5, %v4109_v20  ;;  %v763_v27 = vld [vmem:[#allocation2 + $0x38] sm:$0xff]  ;;  %v765_v29 = vld [vmem:[#allocation2 + $0x48] sm:$0xff]  ;;  %v766_v30 = vld [vmem:[#allocation2 + $0x50] sm:$0xff] }
 0x1cc   : > { %3433 = vmatpush3.msra.mxu0 %v758_v19  ;;  %3424 = vmatprep.subr.mxu1 %v757_v21  ;;  %v767_v31 = vld [vmem:[#allocation2 + $0x58] sm:$0xff]  ;;  %v768_v32 = vld [vmem:[#allocation2 + $0x60] sm:$0xff]  ;;  %v769_v33 = vld [vmem:[#allocation2 + $0x68] sm:$0xff] }
 0x1cd   : > { %3448 = vmatprep.subr.mxu0 %v760_v22  ;;  %3425 = vmatpush3.msra.mxu1 %v757_v21  ;;  %v770_v34 = vld [vmem:[#allocation2 + $0x70] sm:$0xff]  ;;  %v771_v35 = vld [vmem:[#allocation2 + $0x78] sm:$0xff]  ;;  %v772_v36 = vld [vmem:[%s4668_s4] sm:$0xff] }
 0x1ce   : > { %3422 = vmatmul.mubr.msk.f32.gmra.mxu0 %vm777_vm5, %v4118_v23  ;;  %3427 = vmatmul.mubr.msk.f32.vlgmr.msra.gmra.mxu1 %vm777_vm5, %v4104_v18 }
 0x1cf   : > { %3434 = vmatprep.mubr.msk.f32.mxu0 %vm777_vm5, %v4101_v17  ;;  %3440 = vmatprep.subr.mxu1 %v759_v24 }
 0x1d0   : > { %3441 = vmatpush3.msra.mxu1 %v759_v24  ;;  %3429 = vmatprep.mubr.msk.f32.mxu1 %vm777_vm5, %v4109_v20 }
 0x1d1   : > { %3456 = vmatprep.subr.mxu1 %v761_v25 }
 0x1d2   : > { %3435 = vmatmul.mubr.msk.f32.vlgmr.msra.gmra.mxu0 %vm777_vm5, %v4104_v18  ;;  %3430 = vmatmul.mubr.msk.f32.gmra.mxu1 %vm777_vm5, %v4118_v23 }
 0x1d3   : > { %3449 = vmatpush3.msra.mxu0 %v760_v22  ;;  %3437 = vmatprep.mubr.msk.f32.mxu0 %vm777_vm5, %v4109_v20 }
 0x1d4   : > { %3442 = vmatprep.mubr.msk.f32.mxu1 %vm777_vm5, %v4101_v17  ;;  %3464 = vmatprep.subr.mxu0 %v762_v26 }
 0x1d6   : > { %3438 = vmatmul.mubr.msk.f32.gmra.mxu0 %vm777_vm5, %v4118_v23  ;;  %3443 = vmatmul.mubr.msk.f32.vlgmr.msra.gmra.mxu1 %vm777_vm5, %v4104_v18 }
 0x1d7   : > { %3450 = vmatprep.mubr.msk.f32.mxu0 %vm777_vm5, %v4101_v17  ;;  %3457 = vmatpush3.msra.mxu1 %v761_v25 }
 0x1d8   : > { %3445 = vmatprep.mubr.msk.f32.mxu1 %vm777_vm5, %v4109_v20  ;;  %3472 = vmatprep.subr.mxu1 %v763_v27 }
 0x1da   : > { %3451 = vmatmul.mubr.msk.f32.vlgmr.msra.gmra.mxu0 %vm777_vm5, %v4104_v18  ;;  %3446 = vmatmul.mubr.msk.f32.gmra.mxu1 %vm777_vm5, %v4118_v23 }
 0x1db   : > { %3465 = vmatpush3.msra.mxu0 %v762_v26  ;;  %3453 = vmatprep.mubr.msk.f32.mxu0 %vm777_vm5, %v4109_v20 }
 0x1dc   : > { %3458 = vmatprep.mubr.msk.f32.mxu1 %vm777_vm5, %v4101_v17  ;;  %3480 = vmatprep.subr.mxu0 %v764_v28 }
 0x1de   : > { %3454 = vmatmul.mubr.msk.f32.gmra.mxu0 %vm777_vm5, %v4118_v23  ;;  %3459 = vmatmul.mubr.msk.f32.vlgmr.msra.gmra.mxu1 %vm777_vm5, %v4104_v18 }
 0x1df   : > { %3466 = vmatprep.mubr.msk.f32.mxu0 %vm777_vm5, %v4101_v17  ;;  %3473 = vmatpush3.msra.mxu1 %v763_v27 }
 0x1e0   : > { %3461 = vmatprep.mubr.msk.f32.mxu1 %vm777_vm5, %v4109_v20  ;;  %3488 = vmatprep.subr.mxu1 %v765_v29 }
 0x1e2   : > { %3467 = vmatmul.mubr.msk.f32.vlgmr.msra.gmra.mxu0 %vm777_vm5, %v4104_v18  ;;  %3462 = vmatmul.mubr.msk.f32.gmra.mxu1 %vm777_vm5, %v4118_v23 }
 0x1e3   : > { %3481 = vmatpush3.msra.mxu0 %v764_v28  ;;  %3469 = vmatprep.mubr.msk.f32.mxu0 %vm777_vm5, %v4109_v20 }
 0x1e4   : > { %3474 = vmatprep.mubr.msk.f32.mxu1 %vm777_vm5, %v4101_v17  ;;  %3496 = vmatprep.subr.mxu0 %v766_v30 }
 0x1e6   : > { %3470 = vmatmul.mubr.msk.f32.gmra.mxu0 %vm777_vm5, %v4118_v23  ;;  %3475 = vmatmul.mubr.msk.f32.vlgmr.msra.gmra.mxu1 %vm777_vm5, %v4104_v18 }
 0x1e7   : > { %3482 = vmatprep.mubr.msk.f32.mxu0 %vm777_vm5, %v4101_v17  ;;  %3489 = vmatpush3.msra.mxu1 %v765_v29 }
 0x1e8   : > { %3477 = vmatprep.mubr.msk.f32.mxu1 %vm777_vm5, %v4109_v20  ;;  %3504 = vmatprep.subr.mxu1 %v767_v31 }
 0x1ea   : > { %3483 = vmatmul.mubr.msk.f32.vlgmr.msra.gmra.mxu0 %vm777_vm5, %v4104_v18  ;;  %3478 = vmatmul.mubr.msk.f32.gmra.mxu1 %vm777_vm5, %v4118_v23 }
 0x1eb   : > { %3485 = vmatprep.mubr.msk.f32.mxu0 %vm777_vm5, %v4109_v20  ;;  %3490 = vmatprep.mubr.msk.f32.mxu1 %vm777_vm5, %v4101_v17 }
 0x1ec   : > { %3497 = vmatpush3.msra.mxu0 %v766_v30 }
 0x1ed   : > { %3512 = vmatprep.subr.mxu0 %v768_v32 }
 0x1ee   : > { %3486 = vmatmul.mubr.msk.f32.gmra.mxu0 %vm777_vm5, %v4118_v23  ;;  %3491 = vmatmul.mubr.msk.f32.vlgmr.msra.gmra.mxu1 %vm777_vm5, %v4104_v18 }
 0x1ef   : > { %3493 = vmatprep.mubr.msk.f32.mxu1 %vm777_vm5, %v4109_v20  ;;  %3498 = vmatprep.mubr.msk.f32.mxu0 %vm777_vm5, %v4101_v17 }
 0x1f0   : > { %3505 = vmatpush3.msra.mxu1 %v767_v31 }
 0x1f1   : > { %3520 = vmatprep.subr.mxu1 %v769_v33 }
 0x1f2   : > { %3494 = vmatmul.mubr.msk.f32.gmra.mxu1 %vm777_vm5, %v4118_v23  ;;  %3499 = vmatmul.mubr.msk.f32.vlgmr.msra.gmra.mxu0 %vm777_vm5, %v4104_v18 }
 0x1f3   : > { %3501 = vmatprep.mubr.msk.f32.mxu0 %vm777_vm5, %v4109_v20  ;;  %3506 = vmatprep.mubr.msk.f32.mxu1 %vm777_vm5, %v4101_v17 }
 0x1f4   : > { %3513 = vmatpush3.msra.mxu0 %v768_v32 }
 0x1f5   : > { %3528 = vmatprep.subr.mxu0 %v770_v34 }
 0x1f6   : > { %3502 = vmatmul.mubr.msk.f32.gmra.mxu0 %vm777_vm5, %v4118_v23  ;;  %3507 = vmatmul.mubr.msk.f32.vlgmr.msra.gmra.mxu1 %vm777_vm5, %v4104_v18 }
 0x1f7   : > { %3509 = vmatprep.mubr.msk.f32.mxu1 %vm777_vm5, %v4109_v20  ;;  %3514 = vmatprep.mubr.msk.f32.mxu0 %vm777_vm5, %v4101_v17 }
 0x1f8   : > { %3521 = vmatpush3.msra.mxu1 %v769_v33 }
 0x1f9   : > { %3536 = vmatprep.subr.mxu1 %v771_v35 }
 0x1fa   : > { %3510 = vmatmul.mubr.msk.f32.gmra.mxu1 %vm777_vm5, %v4118_v23  ;;  %3515 = vmatmul.mubr.msk.f32.vlgmr.msra.gmra.mxu0 %vm777_vm5, %v4104_v18 }
 0x1fb   : > { %3517 = vmatprep.mubr.msk.f32.mxu0 %vm777_vm5, %v4109_v20  ;;  %3522 = vmatprep.mubr.msk.f32.mxu1 %vm777_vm5, %v4101_v17 }
 0x1fc   : > { %3529 = vmatpush3.msra.mxu0 %v770_v34 }
 0x1fd   : > { %3544 = vmatprep.subr.mxu0 %v772_v36 }
 0x1fe   : > { %3518 = vmatmul.mubr.msk.f32.gmra.mxu0 %vm777_vm5, %v4118_v23  ;;  %3523 = vmatmul.mubr.msk.f32.vlgmr.msra.gmra.mxu1 %vm777_vm5, %v4104_v18 }
 0x1ff   : > { %3525 = vmatprep.mubr.msk.f32.mxu1 %vm777_vm5, %v4109_v20  ;;  %3530 = vmatprep.mubr.msk.f32.mxu0 %vm777_vm5, %v4101_v17 }
 0x200   : > { %3537 = vmatpush3.msra.mxu1 %v771_v35 }
 0x201   : > { %3642 = vmatprep.subr.mxu1 %v772_v36 }
 0x202   : > { %3526 = vmatmul.mubr.msk.f32.gmra.mxu1 %vm777_vm5, %v4118_v23  ;;  %3531 = vmatmul.mubr.msk.f32.vlgmr.msra.gmra.mxu0 %vm777_vm5, %v4104_v18 }
 0x203   : > { %3533 = vmatprep.mubr.msk.f32.mxu0 %vm777_vm5, %v4109_v20  ;;  %3538 = vmatprep.mubr.msk.f32.mxu1 %vm777_vm5, %v4101_v17 }
 0x204   : > { %3545 = vmatpush3.msra.mxu0 %v772_v36 }
 0x206   : > { %3534 = vmatmul.mubr.msk.f32.gmra.mxu0 %vm777_vm5, %v4118_v23  ;;  %3539 = vmatmul.mubr.msk.f32.vlgmr.msra.gmra.mxu1 %vm777_vm5, %v4104_v18 }
 0x207   : > { %3541 = vmatprep.mubr.msk.f32.mxu1 %vm777_vm5, %v4109_v20  ;;  %3643 = vmatpush3.msra.mxu1 %v772_v36 }
 0x20a   : > { %3542 = vmatmul.mubr.msk.f32.gmra.mxu1 %vm777_vm5, %v4118_v23 }
 0x28a   : > { %v3420_v37 = vpop.f32.mrf.mxu0 }
 0x28c   : > { %v856_v38 = vpop.f32.mrf.mxu0 }
 0x28d   : > { %3546 = vmatprep.mubr.msk.f32.mxu0 %vm777_vm5, %v856_v38 }
 0x28e   : > { %v3423_v40 = vpop.f32.mrf.mxu0  ;;  %3547 = vmatmul.mubr.msk.f32.vlgmr.msra.gmra.mxu0 %vm777_vm5, %v3420_v37  ;;  %v3428_v41 = vpop.f32.mrf.mxu1 }
 0x290   : > { %v866_v42 = vpop.f32.mrf.mxu0  ;;  %v941_v43 = vpop.f32.mrf.mxu1 }
 0x291   : > { %3549 = vmatprep.mubr.msk.f32.mxu0 %vm777_vm5, %v866_v42 }
 0x292   : > { %v3436_v44 = vpop.f32.mrf.mxu0  ;;  %3550 = vmatmul.mubr.msk.f32.gmra.mxu0 %vm777_vm5, %v3423_v40  ;;  %v3431_v45 = vpop.f32.mrf.mxu1 }
 0x293   : > { %3552 = vmatprep.mubr.msk.f32.mxu0 %vm777_vm5, %v941_v43 }
 0x294   : > { %v1026_v46 = vpop.f32.mrf.mxu0  ;;  %v951_v47 = vpop.f32.mrf.mxu1 }
 0x296   : > { %v3439_v48 = vpop.f32.mrf.mxu0  ;;  %3553 = vmatmul.mubr.msk.f32.gmra.mxu0 %vm777_vm5, %v3428_v41  ;;  %v3444_v49 = vpop.f32.mrf.mxu1 }
 0x297   : > { %3555 = vmatprep.mubr.msk.f32.mxu0 %vm777_vm5, %v951_v47 }
 0x298   : > { %v1036_v50 = vpop.f32.mrf.mxu0  ;;  %v1111_v51 = vpop.f32.mrf.mxu1 }
 0x29a   : > { %v3452_v52 = vpop.f32.mrf.mxu0  ;;  %3556 = vmatmul.mubr.msk.f32.gmra.mxu0 %vm777_vm5, %v3431_v45  ;;  %v3447_v54 = vpop.f32.mrf.mxu1 }
 0x29b   : > { %3558 = vmatprep.mubr.msk.f32.mxu0 %vm777_vm5, %v1026_v46 }
 0x29c   : > { %v1196_v55 = vpop.f32.mrf.mxu0  ;;  %v1121_v56 = vpop.f32.mrf.mxu1 }
 0x29e   : > { %v3455_v57 = vpop.f32.mrf.mxu0  ;;  %3559 = vmatmul.mubr.msk.f32.gmra.mxu0 %vm777_vm5, %v3436_v44  ;;  %v3460_v39 = vpop.f32.mrf.mxu1 }
 0x29f   : > { %3561 = vmatprep.mubr.msk.f32.mxu0 %vm777_vm5, %v1036_v50 }
 0x2a0   : > { %v1206_v58 = vpop.f32.mrf.mxu0  ;;  %v1281_v59 = vpop.f32.mrf.mxu1 }
 0x2a2   : > { %v3468_v60 = vpop.f32.mrf.mxu0  ;;  %3562 = vmatmul.mubr.msk.f32.gmra.mxu0 %vm777_vm5, %v3439_v48  ;;  %v3463_v61 = vpop.f32.mrf.mxu1 }
 0x2a3   : > { %3564 = vmatprep.mubr.msk.f32.mxu0 %vm777_vm5, %v1111_v51 }
 0x2a4   : > { %v1366_v62 = vpop.f32.mrf.mxu0  ;;  %v1291_v63 = vpop.f32.mrf.mxu1 }
 0x2a6   : > { %v3471_v0 = vpop.f32.mrf.mxu0  ;;  %3565 = vmatmul.mubr.msk.f32.gmra.mxu0 %vm777_vm5, %v3444_v49  ;;  %v3476_v1 = vpop.f32.mrf.mxu1 }
 0x2a7   : > { %3567 = vmatprep.mubr.msk.f32.mxu0 %vm777_vm5, %v1121_v56 }
 0x2a8   : > { %v1376_v2 = vpop.f32.mrf.mxu0  ;;  %v1451_v3 = vpop.f32.mrf.mxu1 }
 0x2aa   : > { %v3484_v5 = vpop.f32.mrf.mxu0  ;;  %3568 = vmatmul.mubr.msk.f32.gmra.mxu0 %vm777_vm5, %v3447_v54  ;;  %v3479_v6 = vpop.f32.mrf.mxu1 }
 0x2ab   : > { %3570 = vmatprep.mubr.msk.f32.mxu0 %vm777_vm5, %v1196_v55 }
 0x2ac   : > { %v1536_v7 = vpop.f32.mrf.mxu0  ;;  %v1461_v53 = vpop.f32.mrf.mxu1 }
 0x2ad   : > { %3594 = vmatprep.mubr.msk.f32.mxu1 %vm777_vm5, %v1536_v7 }
 0x2ae   : > { %v3487_v8 = vpop.f32.mrf.mxu0  ;;  %3571 = vmatmul.mubr.msk.f32.gmra.mxu0 %vm777_vm5, %v3452_v52  ;;  %3595 = vmatmul.mubr.msk.f32.vlgmr.msra.gmra.mxu1 %vm777_vm5, %v3484_v5  ;;  %v3492_v9 = vpop.f32.mrf.mxu1 }
 0x2af   : > { %3573 = vmatprep.mubr.msk.f32.mxu0 %vm777_vm5, %v1206_v58 }
 0x2b0   : > { %v1546_v10 = vpop.f32.mrf.mxu0  ;;  %v1621_v11 = vpop.f32.mrf.mxu1 }
 0x2b1   : > { %3597 = vmatprep.mubr.msk.f32.mxu1 %vm777_vm5, %v1546_v10 }
 0x2b2   : > { %3574 = vmatmul.mubr.msk.f32.gmra.mxu0 %vm777_vm5, %v3455_v57  ;;  %3598 = vmatmul.mubr.msk.f32.gmra.mxu1 %vm777_vm5, %v3487_v8  ;;  %v3495_v12 = vpop.f32.mrf.mxu1  ;;  %v3500_v13 = vpop.f32.mrf.mxu0 }
 0x2b3   : > { %3576 = vmatprep.mubr.msk.f32.mxu0 %vm777_vm5, %v1281_v59  ;;  %3600 = vmatprep.mubr.msk.f32.mxu1 %vm777_vm5, %v1621_v11 }
 0x2b4   : > { %v1631_v14 = vpop.f32.mrf.mxu1  ;;  %v1706_v15 = vpop.f32.mrf.mxu0 }
 0x2b6   : > { %3577 = vmatmul.mubr.msk.f32.gmra.mxu0 %vm777_vm5, %v3460_v39  ;;  %3601 = vmatmul.mubr.msk.f32.gmra.mxu1 %vm777_vm5, %v3492_v9  ;;  %v3503_v16 = vpop.f32.mrf.mxu0  ;;  %v3508_v4 = vpop.f32.mrf.mxu1 }
 0x2b7   : > { %3579 = vmatprep.mubr.msk.f32.mxu0 %vm777_vm5, %v1291_v63  ;;  %3603 = vmatprep.mubr.msk.f32.mxu1 %vm777_vm5, %v1631_v14 }
 0x2b8   : > { %v1716_v17 = vpop.f32.mrf.mxu0  ;;  %v1791_v18 = vpop.f32.mrf.mxu1 }
 0x2ba   : > { %3580 = vmatmul.mubr.msk.f32.gmra.mxu0 %vm777_vm5, %v3463_v61  ;;  %3604 = vmatmul.mubr.msk.f32.gmra.mxu1 %vm777_vm5, %v3495_v12  ;;  %v3511_v19 = vpop.f32.mrf.mxu1  ;;  %v3516_v20 = vpop.f32.mrf.mxu0 }
 0x2bb   : > { %3582 = vmatprep.mubr.msk.f32.mxu0 %vm777_vm5, %v1366_v62  ;;  %3606 = vmatprep.mubr.msk.f32.mxu1 %vm777_vm5, %v1706_v15 }
 0x2bc   : > { %v1801_v21 = vpop.f32.mrf.mxu1  ;;  %v1876_v22 = vpop.f32.mrf.mxu0 }
 0x2be   : > { %3583 = vmatmul.mubr.msk.f32.gmra.mxu0 %vm777_vm5, %v3468_v60  ;;  %3607 = vmatmul.mubr.msk.f32.gmra.mxu1 %vm777_vm5, %v3500_v13  ;;  %v3519_v23 = vpop.f32.mrf.mxu0  ;;  %v3524_v24 = vpop.f32.mrf.mxu1 }
 0x2bf   : > { %3585 = vmatprep.mubr.msk.f32.mxu0 %vm777_vm5, %v1376_v2  ;;  %3609 = vmatprep.mubr.msk.f32.mxu1 %vm777_vm5, %v1716_v17 }
 0x2c0   : > { %v1886_v25 = vpop.f32.mrf.mxu0  ;;  %v1961_v26 = vpop.f32.mrf.mxu1 }
 0x2c2   : > { %3586 = vmatmul.mubr.msk.f32.gmra.mxu0 %vm777_vm5, %v3471_v0  ;;  %3610 = vmatmul.mubr.msk.f32.gmra.mxu1 %vm777_vm5, %v3503_v16  ;;  %v3527_v27 = vpop.f32.mrf.mxu1  ;;  %v3532_v28 = vpop.f32.mrf.mxu0 }
 0x2c3   : > { %3588 = vmatprep.mubr.msk.f32.mxu0 %vm777_vm5, %v1451_v3  ;;  %3612 = vmatprep.mubr.msk.f32.mxu1 %vm777_vm5, %v1791_v18 }
 0x2c4   : > { %v1971_v29 = vpop.f32.mrf.mxu1  ;;  %v2046_v30 = vpop.f32.mrf.mxu0 }
 0x2c6   : > { %3589 = vmatmul.mubr.msk.f32.gmra.mxu0 %vm777_vm5, %v3476_v1  ;;  %3613 = vmatmul.mubr.msk.f32.gmra.mxu1 %vm777_vm5, %v3508_v4  ;;  %v3535_v31 = vpop.f32.mrf.mxu0  ;;  %v3540_v32 = vpop.f32.mrf.mxu1 }
 0x2c7   : > { %3591 = vmatprep.mubr.msk.f32.mxu0 %vm777_vm5, %v1461_v53  ;;  %3615 = vmatprep.mubr.msk.f32.mxu1 %vm777_vm5, %v1801_v21 }
 0x2c8   : > { %v2056_v33 = vpop.f32.mrf.mxu0  ;;  %v2131_v34 = vpop.f32.mrf.mxu1 }
 0x2ca   : > { %3592 = vmatmul.mubr.msk.f32.gmra.mxu0 %vm777_vm5, %v3479_v6  ;;  %3616 = vmatmul.mubr.msk.f32.gmra.mxu1 %vm777_vm5, %v3511_v19  ;;  %v3543_v35 = vpop.f32.mrf.mxu1 }
 0x2cb   : > { %3618 = vmatprep.mubr.msk.f32.mxu1 %vm777_vm5, %v1876_v22 }
 0x2cc   : > { %v2141_v36 = vpop.f32.mrf.mxu1 }
 0x2ce   : > { %3619 = vmatmul.mubr.msk.f32.gmra.mxu1 %vm777_vm5, %v3516_v20 }
 0x2cf   : > { %3621 = vmatprep.mubr.msk.f32.mxu1 %vm777_vm5, %v1886_v25 }
 0x2d2   : > { %3622 = vmatmul.mubr.msk.f32.gmra.mxu1 %vm777_vm5, %v3519_v23 }
 0x2d3   : > { %3624 = vmatprep.mubr.msk.f32.mxu1 %vm777_vm5, %v1961_v26 }
 0x2d6   : > { %3625 = vmatmul.mubr.msk.f32.gmra.mxu1 %vm777_vm5, %v3524_v24 }
 0x2d7   : > { %3627 = vmatprep.mubr.msk.f32.mxu1 %vm777_vm5, %v1971_v29 }
 0x2da   : > { %3628 = vmatmul.mubr.msk.f32.gmra.mxu1 %vm777_vm5, %v3527_v27 }
 0x2db   : > { %3630 = vmatprep.mubr.msk.f32.mxu1 %vm777_vm5, %v2046_v30 }
 0x2de   : > { %3631 = vmatmul.mubr.msk.f32.gmra.mxu1 %vm777_vm5, %v3532_v28 }
 0x2df   : > { %3633 = vmatprep.mubr.msk.f32.mxu1 %vm777_vm5, %v2056_v33 }
 0x2e2   : > { %3634 = vmatmul.mubr.msk.f32.gmra.mxu1 %vm777_vm5, %v3535_v31 }
 0x2e3   : > { %3636 = vmatprep.mubr.msk.f32.mxu1 %vm777_vm5, %v2131_v34 }
 0x2e6   : > { %3637 = vmatmul.mubr.msk.f32.gmra.mxu1 %vm777_vm5, %v3540_v32 }
 0x2e7   : > { %3639 = vmatprep.mubr.msk.f32.mxu1 %vm777_vm5, %v2141_v36 }
 0x2ea   : > { %3640 = vmatmul.mubr.msk.f32.gmra.mxu1 %vm777_vm5, %v3543_v35 }
 0x34e   : > { %v4307_v37 = vpop.f32.mrf.mxu0 }
 0x34f   : > { %v2735_v50 = vsel %vm2727_vm6, %v4307_v37, -inf }
 0x350   : > { %v4309_v38 = vpop.f32.mrf.mxu0 }
 0x351   : > { %v2728_v57 = vsel %vm2727_vm6, %v4309_v38, -inf }
 0x352   : > { %v4311_v40 = vpop.f32.mrf.mxu0 }
 0x353   : > { %v2749_v39 = vsel %vm2727_vm6, %v4311_v40, -inf }
 0x354   : > { %v4313_v41 = vpop.f32.mrf.mxu0 }
 0x355   : > { %v2742_v3 = vsel %vm2727_vm6, %v4313_v41, -inf }
 0x356   : > { %v4315_v42 = vpop.f32.mrf.mxu0 }
 0x357   : > { %v2736_v48 = vsel %vm2727_vm6, %v4315_v42, -inf }
 0x358   : > { %v4317_v43 = vpop.f32.mrf.mxu0  ;;  %v2737_v52 = vmax.f32 %v2735_v50, %v2736_v48 }
 0x359   : > { %v2729_v54 = vsel %vm2727_vm6, %v4317_v43, -inf }
 0x35a   : > { %v4319_v44 = vpop.f32.mrf.mxu0  ;;  %v2730_v62 = vmax.f32 %v2728_v57, %v2729_v54 }
 0x35b   : > { %v2750_v55 = vsel %vm2727_vm6, %v4319_v44, -inf }
 0x35c   : > { %v4321_v45 = vpop.f32.mrf.mxu0  ;;  %v2751_v63 = vmax.f32 %v2749_v39, %v2750_v55 }
 0x35d   : > { %v2743_v12 = vsel %vm2727_vm6, %v4321_v45, -inf }
 0x35e   : > { %v4323_v46 = vpop.f32.mrf.mxu0  ;;  %v2744_v24 = vmax.f32 %v2742_v3, %v2743_v12 }
 0x35f   : > { %v2738_v51 = vsel %vm2727_vm6, %v4323_v46, -inf }
 0x360   : > { %v4325_v47 = vpop.f32.mrf.mxu0  ;;  %v2739_v58 = vmax.f32 %v2737_v52, %v2738_v51 }
 0x361   : > { %v2731_v59 = vsel %vm2727_vm6, %v4325_v47, -inf }
 0x362   : > { %v4329_v49 = vpop.f32.mrf.mxu0  ;;  %v2732_v5 = vmax.f32 %v2730_v62, %v2731_v59 }
 0x363   : > { %v2752_v60 = vsel %vm2727_vm6, %v4329_v49, -inf }
 0x364   : > { %v4339_v56 = vpop.f32.mrf.mxu0  ;;  %v2753_v6 = vmax.f32 %v2751_v63, %v2752_v60 }
 0x365   : > { %v2745_v13 = vsel %vm2727_vm6, %v4339_v56, -inf }
 0x366   : > { %v4349_v61 = vpop.f32.mrf.mxu0  ;;  %v2746_v31 = vmax.f32 %v2744_v24, %v2745_v13 }
 0x367   : > { %v2740_v0 = vsel %vm2727_vm6, %v4349_v61, -inf }
 0x368   : > { %v4353_v1 = vmax.f32 %v2739_v58, %v2740_v0  ;;  %v4355_v2 = vpop.f32.mrf.mxu0 }
 0x369   : > { %v2733_v7 = vsel %vm2727_vm6, %v4355_v2, -inf }
 0x36a   : > { %v2757_v53 = vsub.f32 %v4307_v37, %v4353_v1  ;;  %v2761_v8 = vsub.f32 %v4315_v42, %v4353_v1  ;;  %v2765_v9 = vsub.f32 %v4323_v46, %v4353_v1  ;;  %v2769_v10 = vsub.f32 %v4349_v61, %v4353_v1  ;;  %v4369_v11 = vpop.f32.mrf.mxu0 }
 0x36b   : > { %v4375_v14 = vmax.f32 %v2732_v5, %v2733_v7  ;;  %v2754_v15 = vsel %vm2727_vm6, %v4369_v11, -inf }
 0x36c   : > { %v2774_v16 = vmul.f32 1.442695, %v2757_v53  ;;  %v2782_v4 = vmul.f32 1.442695, %v2761_v8  ;;  %v2790_v17 = vmul.f32 1.442695, %v2765_v9  ;;  %v4379_v18 = vmax.f32 %v2753_v6, %v2754_v15  ;;  %v4387_v23 = vpop.f32.mrf.mxu0 }
 0x36d   : > { %v2798_v19 = vmul.f32 1.442695, %v2769_v10  ;;  %v2756_v20 = vsub.f32 %v4309_v38, %v4375_v14  ;;  %v2760_v21 = vsub.f32 %v4317_v43, %v4375_v14  ;;  %v2764_v22 = vsub.f32 %v4325_v47, %v4375_v14 }
 0x36e   : > { %3747 = vpow2.f32 %v2774_v16  ;;  %v2768_v25 = vsub.f32 %v4355_v2, %v4375_v14  ;;  %v2759_v26 = vsub.f32 %v4311_v40, %v4379_v18  ;;  %v4393_v27 = vpop.f32.mrf.mxu1  ;;  %v2763_v30 = vsub.f32 %v4319_v44, %v4379_v18  ;;  %v4405_v50 = vpop.f32.mrf.mxu0 }
 0x36f   : > { %3749 = vpow2.f32 %v2782_v4  ;;  %v2772_v28 = vmul.f32 1.442695, %v2756_v20  ;;  %v2780_v29 = vmul.f32 1.442695, %v2760_v21  ;;  %v2788_v32 = vmul.f32 1.442695, %v2764_v22 }
 0x370   : > { %3751 = vpow2.f32 %v2790_v17  ;;  %v2767_v33 = vsub.f32 %v4329_v49, %v4379_v18  ;;  %v4399_v34 = vpop.f32.mrf.mxu1  ;;  %v2796_v35 = vmul.f32 1.442695, %v2768_v25  ;;  %v2771_v36 = vsub.f32 %v4369_v11, %v4379_v18  ;;  %v4421_v0 = vpop.f32.mrf.mxu0 }
 0x371   : > { %3753 = vpow2.f32 %v2798_v19  ;;  %v2747_v48 = vsel %vm2727_vm6, %v4387_v23, -inf  ;;  %v2778_v51 = vmul.f32 1.442695, %v2759_v26  ;;  %v2786_v55 = vmul.f32 1.442695, %v2763_v30 }
 0x372   : > { %3755 = vpow2.f32 %v2772_v28  ;;  %v4407_v52 = vmax.f32 %v2746_v31, %v2747_v48  ;;  %v4409_v54 = vpop.f32.mrf.mxu1  ;;  %v2794_v57 = vmul.f32 1.442695, %v2767_v33  ;;  %v2802_v62 = vmul.f32 1.442695, %v2771_v36  ;;  %v4427_v9 = vpop.f32.mrf.mxu0 }
 0x373   : > { %3757 = vpow2.f32 %v2780_v29 }
 0x374   : > { %3759 = vpow2.f32 %v2788_v32  ;;  %v2758_v39 = vsub.f32 %v4313_v41, %v4407_v52  ;;  %v2762_v58 = vsub.f32 %v4321_v45, %v4407_v52  ;;  %v2766_v59 = vsub.f32 %v4339_v56, %v4407_v52  ;;  %v4417_v60 = vpop.f32.mrf.mxu1  ;;  %v4435_v19 = vpop.f32.mrf.mxu0 }
 0x375   : > { %3761 = vpow2.f32 %v2796_v35  ;;  %v2770_v63 = vsub.f32 %v4387_v23, %v4407_v52 }
 0x376   : > { %3763 = vpow2.f32 %v2778_v51  ;;  %v2776_v3 = vmul.f32 1.442695, %v2758_v39  ;;  %v4423_v5 = vpop.f32.mrf.mxu1  ;;  %v2784_v6 = vmul.f32 1.442695, %v2762_v58  ;;  %v2792_v7 = vmul.f32 1.442695, %v2766_v59  ;;  %v4445_v35 = vpop.f32.mrf.mxu0 }
 0x377   : > { %3765 = vpow2.f32 %v2786_v55  ;;  %v2800_v8 = vmul.f32 1.442695, %v2770_v63 }
 0x378   : > { %3767 = vpow2.f32 %v2794_v57  ;;  %v4425_v53 = vpop.f32.mrf.mxu1 }
 0x379   : > { %3769 = vpow2.f32 %v2802_v62 }
 0x37a   : > { %3771 = vpow2.f32 %v2776_v3  ;;  %v4429_v10 = vpop.f32.mrf.mxu1 }
 0x37b   : > { %v3748_v12 = vpop.eup %3747  ;;  %3773 = vpow2.f32 %v2784_v6 }
 0x37c   : > { %v3750_v13 = vpop.eup %3749  ;;  %v2811_v15 = vsel %vm2727_vm6, %v3748_v12, 0.0  ;;  %3775 = vpow2.f32 %v2792_v7  ;;  %v4432_v16 = vpop.f32.mrf.mxu1 }
 0x37d   : > { %v3752_v4 = vpop.eup %3751  ;;  %v2812_v17 = vsel %vm2727_vm6, %v3750_v13, 0.0  ;;  %3777 = vpow2.f32 %v2800_v8  ;;  %v4455_v8 = vpop.f32.mrf.mxu0 }
 0x37e   : > { %v3754_v20 = vpop.eup %3753  ;;  %v2813_v21 = vadd.f32 %v2812_v17, %v2811_v15  ;;  %v4437_v22 = vpop.f32.mrf.mxu1  ;;  %v2814_v25 = vsel %vm2727_vm6, %v3752_v4, 0.0 }
 0x37f   : > { %v3756_v24 = vpop.eup %3755  ;;  %v2816_v32 = vsel %vm2727_vm6, %v3754_v20, 0.0 }
 0x380   : > { %v3758_v26 = vpop.eup %3757  ;;  %v2815_v28 = vadd.f32 %v2814_v25, %v2813_v21  ;;  %v2804_v29 = vsel %vm2727_vm6, %v3756_v24, 0.0  ;;  %v4441_v30 = vpop.f32.mrf.mxu1 }
 0x381   : > { %v3760_v31 = vpop.eup %3759  ;;  %v2805_v33 = vsel %vm2727_vm6, %v3758_v26, 0.0 }
 0x382   : > { %v3762_v36 = vpop.eup %3761  ;;  %v2817_v48 = vadd.f32 %v2816_v32, %v2815_v28  ;;  %v2806_v51 = vadd.f32 %v2805_v33, %v2804_v29  ;;  %v4447_v55 = vpop.f32.mrf.mxu1  ;;  %v2807_v39 = vsel %vm2727_vm6, %v3760_v31, 0.0 }
 0x383   : > { %v3764_v57 = vpop.eup %3763  ;;  %v2809_v6 = vsel %vm2727_vm6, %v3762_v36, 0.0  ;;  %v4465_v32 = vpop.f32.mrf.mxu0 }
 0x384   : > { %v3766_v58 = vpop.eup %3765  ;;  %3779 = vlog2.f32 %v2817_v48  ;;  %v2808_v59 = vadd.f32 %v2807_v39, %v2806_v51  ;;  %v2825_v62 = vsel %vm2727_vm6, %v3764_v57, 0.0  ;;  %v4451_v63 = vpop.f32.mrf.mxu1 }
 0x385   : > { %v3768_v3 = vpop.eup %3767  ;;  %v2826_v7 = vsel %vm2727_vm6, %v3766_v58, 0.0 }
 0x386   : > { %v3770_v12 = vpop.eup %3769  ;;  %v2810_v13 = vadd.f32 %v2809_v6, %v2808_v59  ;;  %v2827_v15 = vadd.f32 %v2826_v7, %v2825_v62  ;;  %v4457_v4 = vpop.f32.mrf.mxu1  ;;  %v2828_v20 = vsel %vm2727_vm6, %v3768_v3, 0.0 }
 0x387   : > { %v3772_v17 = vpop.eup %3771  ;;  %v2830_v29 = vsel %vm2727_vm6, %v3770_v12, 0.0  ;;  %v4473_v62 = vpop.f32.mrf.mxu0 }
 0x388   : > { %v3774_v21 = vpop.eup %3773  ;;  %3781 = vlog2.f32 %v2810_v13  ;;  %v2829_v24 = vadd.f32 %v2828_v20, %v2827_v15  ;;  %v2818_v25 = vsel %vm2727_vm6, %v3772_v17, 0.0  ;;  %v4461_v26 = vpop.f32.mrf.mxu1 }
 0x389   : > { %v3776_v28 = vpop.eup %3775  ;;  %v2819_v31 = vsel %vm2727_vm6, %v3774_v21, 0.0  ;;  %v4475_v13 = vpop.f32.mrf.mxu0 }
 0x38a   : > { %v3778_v33 = vpop.eup %3777  ;;  %v2831_v36 = vadd.f32 %v2830_v29, %v2829_v24  ;;  %v2820_v48 = vadd.f32 %v2819_v31, %v2818_v25  ;;  %v4467_v51 = vpop.f32.mrf.mxu1  ;;  %v2821_v57 = vsel %vm2727_vm6, %v3776_v28, 0.0 }
 0x38b   : > { %v2823_v59 = vsel %vm2727_vm6, %v3778_v33, 0.0  ;;  %v4481_v31 = vpop.f32.mrf.mxu0 }
 0x38c   : > { %3783 = vlog2.f32 %v2831_v36  ;;  %v2822_v39 = vadd.f32 %v2821_v57, %v2820_v48  ;;  %v4470_v58 = vpop.f32.mrf.mxu1 }
 0x38e   : > { %v2824_v3 = vadd.f32 %v2823_v59, %v2822_v39  ;;  %v3620_v6 = vpop.f32.mrf.mxu1 }
 0x38f   : > { %v2877_v20 = vmul.f32 %v3620_v6, %v4393_v27  ;;  %v2926_v24 = vmul.f32 %v3620_v6, %v4405_v50 }
 0x390   : > { %3785 = vlog2.f32 %v2824_v3  ;;  %v2648_v7 = vpop.f32.mrf.mxu1  ;;  %v4506_v3 = vpop.f32.mrf.mxu0 }
 0x391   : > { %v3780_v12 = vpop.eup %3779  ;;  %v2876_v25 = vmul.f32 %v2648_v7, %v4399_v34  ;;  %v2925_v33 = vmul.f32 %v2648_v7, %v4421_v0  ;;  %v2899_v39 = vsel %vm2727_vm6, %v2877_v20, 0.0 }
 0x392   : > { %v2835_v15 = vmul.f32 0.6931472, %v3780_v12  ;;  %v3623_v17 = vpop.f32.mrf.mxu1 }
 0x393   : > { %v2879_v36 = vmul.f32 %v3623_v17, %v4409_v54  ;;  %v2941_v6 = vsel %vm2727_vm6, %v2925_v33, 0.0 }
 0x394   : > { %v2841_v21 = vadd.f32 %v2835_v15, %v4353_v1  ;;  %v2658_v28 = vpop.f32.mrf.mxu1 }
 0x395   : > { %v3782_v29 = vpop.eup %3781  ;;  %v2913_v7 = vsel %vm2727_vm6, %v2879_v36, 0.0  ;;  %v2927_v12 = vmul.f32 %v2658_v28, %v4435_v19 }
 0x396   : > { %v2845_v27 = vsub.f32 %v4307_v37, %v2841_v21  ;;  %v2849_v1 = vsub.f32 %v4315_v42, %v2841_v21  ;;  %v2853_v48 = vsub.f32 %v4323_v46, %v2841_v21  ;;  %v2857_v50 = vsub.f32 %v4349_v61, %v2841_v21  ;;  %v3626_v57 = vpop.f32.mrf.mxu1 }
 0x397   : > { %v2833_v34 = vmul.f32 0.6931472, %v3782_v29  ;;  %v2881_v59 = vmul.f32 %v3626_v57, %v4423_v5  ;;  %v2948_v37 = vsel %vm2727_vm6, %v2926_v24, 0.0  ;;  %v4501_v42 = vsel %vm2727_vm6, %v2876_v25, 0.0 }
 0x398   : > { %2861 = vst.msk [vmem:[%s3999_s8 + $0x8] sm:$0xff] %vm2727_vm6, %v2845_v27  ;;  %2865 = vst.msk [vmem:[%s3999_s8 + $0x28] sm:$0xff] %vm2727_vm6, %v2849_v1  ;;  %v2928_v46 = vmul.f32 %v3623_v17, %v4427_v9  ;;  %v2878_v61 = vmul.f32 %v2658_v28, %v4417_v60  ;;  %v2668_v54 = vpop.f32.mrf.mxu1  ;;  %v2930_v60 = vmul.f32 %v3626_v57, %v4445_v35 }
 0x399   : > { %2869 = vst.msk [vmem:[%s3999_s8 + $0x48] sm:$0xff] %vm2727_vm6, %v2853_v48  ;;  %2873 = vst.msk [vmem:[%s3999_s8 + $0x68] sm:$0xff] %vm2727_vm6, %v2857_v50  ;;  %v3784_v0 = vpop.eup %3783  ;;  %v2840_v5 = vadd.f32 %v2833_v34, %v4375_v14  ;;  %v2900_v20 = vsel %vm2727_vm6, %v2881_v59, 0.0  ;;  %v2880_v9 = vmul.f32 %v2668_v54, %v4425_v53  ;;  %v2929_v35 = vmul.f32 %v2668_v54, %v4455_v8 }
 0x39a   : > { %v2839_v15 = vmul.f32 0.6931472, %v3784_v0  ;;  %v3629_v14 = vpop.f32.mrf.mxu1  ;;  %v2962_v28 = vsel %vm2727_vm6, %v2928_v46, 0.0  ;;  %v2906_v29 = vsel %vm2727_vm6, %v2878_v61, 0.0  ;;  %v2949_v57 = vsel %vm2727_vm6, %v2930_v60, 0.0 }
 0x39b   : > { %v2844_v17 = vsub.f32 %v4309_v38, %v2840_v5  ;;  %v2848_v21 = vsub.f32 %v4317_v43, %v2840_v5  ;;  %v2852_v24 = vsub.f32 %v4325_v47, %v2840_v5  ;;  %v2856_v19 = vsub.f32 %v4355_v2, %v2840_v5  ;;  %v4530_v38 = vpop.f32.mrf.mxu0 }
 0x39c   : > { %v2843_v25 = vadd.f32 %v2839_v15, %v4379_v18  ;;  %v2678_v33 = vpop.f32.mrf.mxu1  ;;  %v2955_v43 = vsel %vm2727_vm6, %v2927_v12, 0.0  ;;  %v2901_v47 = vadd.f32 %v2900_v20, %v2899_v39  ;;  %v2883_v2 = vmul.f32 %v3629_v14, %v4429_v10 }
 0x39d   : > { %v3786_v36 = vpop.eup %3785  ;;  %2860 = vst.msk [vmem:[%s3999_s8] sm:$0xff] %vm2727_vm6, %v2844_v17  ;;  %2864 = vst.msk [vmem:[%s3999_s8 + $0x20] sm:$0xff] %vm2727_vm6, %v2848_v21  ;;  %v2932_v18 = vmul.f32 %v3629_v14, %v4465_v32  ;;  %v2893_v34 = vsel %vm2727_vm6, %v2880_v9, 0.0  ;;  %v2882_v39 = vmul.f32 %v2678_v33, %v4432_v16  ;;  %v3590_v16 = vpop.f32.mrf.mxu0  ;;  %v2950_v54 = vadd.f32 %v2949_v57, %v2948_v37 }
 0x39e   : > { %2868 = vst.msk [vmem:[%s3999_s8 + $0x40] sm:$0xff] %vm2727_vm6, %v2852_v24  ;;  %2872 = vst.msk [vmem:[%s3999_s8 + $0x60] sm:$0xff] %vm2727_vm6, %v2856_v19  ;;  %v2847_v53 = vsub.f32 %v4311_v40, %v2843_v25  ;;  %v2851_v8 = vsub.f32 %v4319_v44, %v2843_v25  ;;  %v2855_v27 = vsub.f32 %v4329_v49, %v2843_v25  ;;  %v3632_v48 = vpop.f32.mrf.mxu1  ;;  %v2837_v50 = vmul.f32 0.6931472, %v3786_v36 }
 0x39f   : > { %v2859_v1 = vsub.f32 %v4369_v11, %v2843_v25  ;;  %v2942_v40 = vsel %vm2727_vm6, %v2929_v35, 0.0  ;;  %v2914_v44 = vsel %vm2727_vm6, %v2883_v2, 0.0  ;;  %v2963_v49 = vsel %vm2727_vm6, %v2932_v18, 0.0 }
 0x3a0   : > { %2863 = vst.msk [vmem:[%s3999_s8 + $0x18] sm:$0xff] %vm2727_vm6, %v2847_v53  ;;  %2867 = vst.msk [vmem:[%s3999_s8 + $0x38] sm:$0xff] %vm2727_vm6, %v2851_v8  ;;  %v2931_v11 = vmul.f32 %v2678_v33, %v4473_v62  ;;  %v2688_v10 = vpop.f32.mrf.mxu1  ;;  %v2842_v32 = vadd.f32 %v2837_v50, %v4407_v52  ;;  %v2885_v59 = vmul.f32 %v3632_v48, %v4437_v22  ;;  %v2907_v0 = vsel %vm2727_vm6, %v2882_v39, 0.0 }
 0x3a1   : > { %2871 = vst.msk [vmem:[%s3999_s8 + $0x58] sm:$0xff] %vm2727_vm6, %v2855_v27  ;;  %2875 = vst.msk [vmem:[%s3999_s8 + $0x78] sm:$0xff] %vm2727_vm6, %v2859_v1  ;;  %v2934_v46 = vmul.f32 %v3632_v48, %v4475_v13  ;;  %v2884_v61 = vmul.f32 %v2688_v10, %v4441_v30  ;;  %v2933_v62 = vmul.f32 %v2688_v10, %v4481_v31 }
 0x3a2   : > { %v2956_v5 = vsel %vm2727_vm6, %v2931_v11, 0.0  ;;  %v3635_v12 = vpop.f32.mrf.mxu1  ;;  %v2846_v52 = vsub.f32 %v4313_v41, %v2842_v32  ;;  %v2850_v22 = vsub.f32 %v4321_v45, %v2842_v32  ;;  %v2854_v13 = vsub.f32 %v4339_v56, %v2842_v32  ;;  %v2548_v41 = vpop.f32.mrf.mxu0 }
 0x3a3   : > { %v2858_v15 = vsub.f32 %v4387_v23, %v2842_v32  ;;  %v2894_v30 = vadd.f32 %v2893_v34, %v4501_v42  ;;  %v2943_v37 = vadd.f32 %v2942_v40, %v2941_v6  ;;  %v2915_v20 = vadd.f32 %v2914_v44, %v2913_v7 }
 0x3a4   : > { %v2964_v60 = vadd.f32 %v2963_v49, %v2962_v28  ;;  %v2698_v9 = vpop.f32.mrf.mxu1  ;;  %2862 = vst.msk [vmem:[%s3999_s8 + $0x10] sm:$0xff] %vm2727_vm6, %v2846_v52  ;;  %2866 = vst.msk [vmem:[%s3999_s8 + $0x30] sm:$0xff] %vm2727_vm6, %v2850_v22  ;;  %v2902_v45 = vsel %vm2727_vm6, %v2885_v59, 0.0  ;;  %v2951_v56 = vsel %vm2727_vm6, %v2934_v46, 0.0  ;;  %v2895_v23 = vsel %vm2727_vm6, %v2884_v61, 0.0 }
 0x3a5   : > { %2870 = vst.msk [vmem:[%s3999_s8 + $0x50] sm:$0xff] %vm2727_vm6, %v2854_v13  ;;  %2874 = vst.msk [vmem:[%s3999_s8 + $0x70] sm:$0xff] %vm2727_vm6, %v2858_v15  ;;  %v2887_v31 = vmul.f32 %v3635_v12, %v4447_v55  ;;  %v2908_v42 = vadd.f32 %v2907_v0, %v2906_v29  ;;  %v2957_v6 = vadd.f32 %v2956_v5, %v2955_v43  ;;  %v2944_v7 = vsel %vm2727_vm6, %v2933_v62, 0.0  ;;  %v3593_v29 = vpop.f32.mrf.mxu0 }
 0x3a6   : > { %v2936_v14 = vmul.f32 %v3635_v12, %v4506_v3  ;;  %v3638_v17 = vpop.f32.mrf.mxu1  ;;  %v2886_v24 = vmul.f32 %v2698_v9, %v4451_v63  ;;  %v2903_v28 = vadd.f32 %v2902_v45, %v2901_v47  ;;  %v2952_v35 = vadd.f32 %v2951_v56, %v2950_v54 }
 0x3a7   : > { %v2916_v21 = vsel %vm2727_vm6, %v2887_v31, 0.0  ;;  %v2889_v19 = vmul.f32 %v3638_v17, %v4457_v4  ;;  %v2938_v25 = vmul.f32 %v3638_v17, %v3590_v16  ;;  %v2896_v33 = vadd.f32 %v2895_v23, %v2894_v30  ;;  %v2558_v40 = vpop.f32.mrf.mxu0 }
 0x3a8   : > { %v2935_v36 = vmul.f32 %v2698_v9, %v4530_v38  ;;  %v2708_v55 = vpop.f32.mrf.mxu1  ;;  %v2945_v43 = vadd.f32 %v2944_v7, %v2943_v37  ;;  %v2917_v2 = vadd.f32 %v2916_v21, %v2915_v20  ;;  %v2965_v3 = vsel %vm2727_vm6, %v2936_v14, 0.0 }
 0x3a9   : > { %v2904_v18 = vsel %vm2727_vm6, %v2889_v19, 0.0  ;;  %v2953_v63 = vsel %vm2727_vm6, %v2938_v25, 0.0  ;;  %v2888_v4 = vmul.f32 %v2708_v55, %v4461_v26  ;;  %v2937_v47 = vmul.f32 %v2708_v55, %v2548_v41 }
 0x3aa   : > { %v2905_v53 = vadd.f32 %v2904_v18, %v2903_v28  ;;  %v3641_v8 = vpop.f32.mrf.mxu1  ;;  %v2909_v27 = vsel %vm2727_vm6, %v2886_v24, 0.0  ;;  %v2954_v38 = vadd.f32 %v2953_v63, %v2952_v35  ;;  %v2966_v50 = vadd.f32 %v2965_v3, %v2964_v60 }
 0x3ab   : > { %v2891_v1 = vmul.f32 %v3641_v8, %v4467_v51  ;;  %v2940_v48 = vmul.f32 %v3641_v8, %v3593_v29  ;;  %v2958_v57 = vsel %vm2727_vm6, %v2935_v36, 0.0  ;;  %v2897_v34 = vsel %vm2727_vm6, %v2888_v4, 0.0 }
 0x3ac   : > { %3242 = vst.msk [vmem:[%s3999_s8 + $0x88] sm:$0xff] %vm2727_vm6, %v2905_v53  ;;  %v2946_v39 = vsel %vm2727_vm6, %v2937_v47, 0.0  ;;  %v2718_v26 = vpop.f32.mrf.mxu1  ;;  %3246 = vst.msk [vmem:[%s3999_s8 + $0xa8] sm:$0xff] %vm2727_vm6, %v2954_v38  ;;  %v2898_v44 = vadd.f32 %v2897_v34, %v2896_v33  ;;  %v2910_v46 = vadd.f32 %v2909_v27, %v2908_v42  ;;  %v2959_v61 = vadd.f32 %v2958_v57, %v2957_v6 }
 0x3ad   : > { %v2947_v51 = vadd.f32 %v2946_v39, %v2945_v43  ;;  %v2918_v49 = vsel %vm2727_vm6, %v2891_v1, 0.0  ;;  %v2967_v11 = vsel %vm2727_vm6, %v2940_v48, 0.0  ;;  %v2890_v16 = vmul.f32 %v2718_v26, %v4470_v58 }
 0x3ae   : > { %v2919_v10 = vadd.f32 %v2918_v49, %v2917_v2  ;;  %v2968_v32 = vadd.f32 %v2967_v11, %v2966_v50  ;;  %v2939_v59 = vmul.f32 %v2718_v26, %v2558_v40  ;;  %3241 = vst.msk [vmem:[%s3999_s8 + $0x80] sm:$0xff] %vm2727_vm6, %v2898_v44 }
 0x3af   : > { %3245 = vst.msk [vmem:[%s3999_s8 + $0xa0] sm:$0xff] %vm2727_vm6, %v2947_v51  ;;  %v2911_v54 = vsel %vm2727_vm6, %v2890_v16, 0.0 }
 0x3b0   : > { %3244 = vst.msk [vmem:[%s3999_s8 + $0x98] sm:$0xff] %vm2727_vm6, %v2919_v10  ;;  %3248 = vst.msk [vmem:[%s3999_s8 + $0xb8] sm:$0xff] %vm2727_vm6, %v2968_v32  ;;  %v2960_v0 = vsel %vm2727_vm6, %v2939_v59, 0.0  ;;  %v2912_v5 = vadd.f32 %v2911_v54, %v2910_v46 }
 0x3b1   : > { %v2961_v62 = vadd.f32 %v2960_v0, %v2959_v61 }
 0x3b2   : > { %3243 = vst.msk [vmem:[%s3999_s8 + $0x90] sm:$0xff] %vm2727_vm6, %v2912_v5 }
 0x3b3   : > { %3247 = vst.msk [vmem:[%s3999_s8 + $0xb0] sm:$0xff] %vm2727_vm6, %v2961_v62 }
 0x3b4   : > { %s3647_s5 = smul.u32 48, %s3841_s27  ;;  %s3000_s7 = sshll.u32 %s3999_s8, 4  ;;  %s3001_s7 = int_to_ptr.vmem [resolvable:$true] %s3000_s7 }
 0x3b5   : > { %s3865_s13 = smov 512   ;;  %s3866_s18 = smov 1024  }
 0x3b6   : > { %s2987_s10 = sadd.s32 %s3647_s5, %s3986_s19  ;;  %3648 = sst [smem:[#allocation7]] (%p3961_p3), %s3865_s13 }
 0x3b7   : > { %s3250_s14 = sshll.u32 %s2987_s10, 7  ;;  %3649 = sst [smem:[#allocation7 + $0x1]] (%p3961_p3), %s3866_s18 }
 0x3b8   : > { %s2989_s21 = scalar_lea.hbm %s4670_s6, %s3250_s14  ;;  %s3867_s9 = smov 4  }
 0x3b9   : > { %3650 = sst [smem:[#allocation7 + $0x2]] (%p3961_p3), %s3867_s9  ;;  %s3868_s27 = smov 128  }
 0x3ba   : > { %3651 = sst [smem:[#allocation7 + $0x3]] (%p3961_p3), %s3868_s27  ;;  %s3869_s8 = smov 8  }
 0x3bb   : > { %3652 = sst [smem:[#allocation7 + $0x4]] (%p3961_p3), %s3868_s27  ;;  %s3870_s19 = smov 131072  }
 0x3bc   : > { %3653 = sst [smem:[#allocation7 + $0x5]] (%p3961_p3), %s3869_s8  ;;  %s3871_s26 = smov 0  }
 0x3bd   : > { %3654 = dma.general (%p3961_p3), %s3001_s7, 3072, %s2989_s21, %s2975_s17, %s3870_s19, [#allocation7], %s3871_s26, 0  }
 0x3be PF: > { %p3660_p1 = scmp.ge.s32.totalorder %s3853_s30, 2  ;;  %s3028_s22 = sand.u32 1, %s3825_s23  }
 0x3bf   : > { %s3029_s5 = scalar_lea.sflag [#allocation5], %s3028_s22 }
 0x3c0   : > { %p3657_p2 = pnand %p3660_p1, %p3970_p8 }
 0x3c2   : > { %p3658_p4 = pneg %p3657_p2 }
 0x3c4   : > { %3820 = dma.done.wait (%p3658_p4), %s3029_s5, 3072  }
 0x3c5   : > { %3822 = vsyncadd (%p3658_p4), %s3029_s5, 4294964224  ;;  %s21_s30 = sadd.s32 1, %s3853_s30   ;;  %s4679_s11 = sld [smem:[#allocation9_spill]] }
 0x3c6   : > { %p18_p5 = scmp.ge.s32.totalorder %s21_s30, 6   ;;  %s4680_s17 = sld [smem:[#allocation10_spill]] }
 0x3c7   : > { %s4681_s23 = smov %s3829_s24  ;;  %s4682_s24 = smov %s3833_s25 }
 0x3c8   : > { %s4683_s25 = smov %s3979_s16  ;;  %s4684_s26 = smov %s3845_s28 }
 0x3c9   : > { %s4685_s27 = smov %s3849_s29  ;;  %20 = sbr.rel (!%p18_p5) target bundleno = 8 (0x8), region = 93 }
 0x3cb   : > { %s4686_s28 = smov %s4679_s11 }
 0x3cc   : > { %s4687_s29 = smov %s4680_s17 }
 0x3ce   :  { %3034 = vsyncpa [#allocation5], 1 }
 0x3cf   :  { %3036 = vsyncpa [#allocation5 + $0x1], 1 }

</bundles_post_ra>
